<compile_context>
chip_gen: v5e
topology: v5e:2x2
jax: 0.10.0
libtpu: 0.0.40
codegen_flags: <defaults>
</compile_context>

<pallas_src>
import jax
import jax.numpy as jnp
from jax.experimental import pallas as pl
from jax.experimental.pallas import tpu as pltpu


def _se_conv1x1_kernel(scale_ref, x_ref, w_ref, o_ref):
    # scale_ref: (Cin, 1)   f32   gate logits (column vector -> lane broadcast)
    # x_ref:     (Cin, M)   f32   activations, channels-major
    # w_ref:     (Cout,Cin) bf16  1x1 conv weight, already bf16 at rest
    # o_ref:     (Cout, M)  f32
    s = jax.nn.sigmoid(scale_ref[...])                   # EUP, f32, (Cin, 1)
    x_scaled = x_ref[...] * s                             # VPU f32, lane-bcast of s
    # W @ (diag(sigmoid(s)) @ X): weight is bf16 at rest (no per-call cast);
    # X gets a single f32->bf16 downcast; MXU accumulates in f32.
    o_ref[...] = jnp.dot(
        w_ref[...],
        x_scaled.astype(jnp.bfloat16),
        preferred_element_type=jnp.float32,
    ).astype(o_ref.dtype)


def prepare_conv1x1_weight(weight_oi11):
    """One-time parameter prep: (Cout, Cin, 1, 1) f32 -> (Cout, Cin) bf16."""
    c_out, c_in = weight_oi11.shape[:2]
    return weight_oi11.reshape(c_out, c_in).astype(jnp.bfloat16)


def se_scale_conv1x1(x_nchw, scale_nc11, w_mat_bf16):
    """sigmoid(scale) * x, then 1x1 conv (no bias). NCHW in / NCHW out."""
    n, c_in, h, w = x_nchw.shape
    c_out = w_mat_bf16.shape[0]
    # Module spec is batch-1; (1,C,H,W) -> (C, H*W) is a pure reshape.
    # TODO(synk): for N > 1, add a leading batch grid axis marked "parallel"
    # (pltpu.CompilerParams(dimension_semantics=("parallel", ...))) so v7x's
    # two TensorCores both get work, instead of looping in the wrapper.
    assert n == 1, "kernel is laid out for the module's batch-1 forward"
    m = h * w

    # reshape-only glue (zero HBM data movement, no transposes)
    x_mat = x_nchw.reshape(c_in, m)          # (Cin, M)
    scale = scale_nc11.reshape(c_in, 1)      # (Cin, 1) -> broadcasts along lanes

    # bytes_accessed reflects the per-array at-rest dtypes (weight is bf16).
    cost = pl.CostEstimate(
        flops=2 * m * c_in * c_out,
        transcendentals=c_in,
        bytes_accessed=(x_mat.size * x_mat.dtype.itemsize
                        + scale.size * scale.dtype.itemsize
                        + w_mat_bf16.size * w_mat_bf16.dtype.itemsize
                        + c_out * m * jnp.dtype(x_nchw.dtype).itemsize),
    )

    vmem = pl.BlockSpec(memory_space=pltpu.MemorySpace.VMEM)  # whole array, no grid
    out_mat = pl.pallas_call(
        _se_conv1x1_kernel,
        out_shape=jax.ShapeDtypeStruct((c_out, m), x_nchw.dtype),
        in_specs=[vmem, vmem, vmem],
        out_specs=vmem,
        cost_estimate=cost,
    )(scale, x_mat, w_mat_bf16)

    # reshape-only back to NCHW
    return out_mat.reshape(n, c_out, h, w)


if __name__ == "__main__":
    key = jax.random.PRNGKey(0)
    k1, k2, k3 = jax.random.split(key, 3)

    N, C, H, W = 1, 320, 14, 14
    x127 = jax.random.normal(k1, (N, C, H, W), dtype=jnp.float32)
    x131 = jax.random.normal(k2, (N, C, 1, 1), dtype=jnp.float32)
    # deterministic conv weight init (kaiming-uniform-like scale), (Cout, Cin, 1, 1)
    bound = 1.0 / (C ** 0.5)
    weight = jax.random.uniform(k3, (C, C, 1, 1), dtype=jnp.float32,
                                minval=-bound, maxval=bound)

    # one-time parameter prep (bf16 at rest) — done at init, not per call
    w_bf16 = prepare_conv1x1_weight(weight)

    fwd = jax.jit(se_scale_conv1x1)
    out = fwd(x127, x131, w_bf16)
    out = jax.block_until_ready(out)

    # reference (pure JAX, f32).  Tolerance covers the bf16 weight-at-rest and
    # bf16 MXU operands with f32 accumulation over K=320 (~1e-3-level error).
    ref = jnp.einsum(
        "nihw,oi->nohw",
        x127 * jax.nn.sigmoid(x131),
        weight.reshape(C, C),
    )
    assert out.shape == (N, C, H, W)
    assert jnp.allclose(out, ref, atol=2e-2, rtol=2e-2), \
        float(jnp.max(jnp.abs(out - ref)))

    print("KERNEL_OK")
</pallas_src>

<mosaic_0001>
module attributes {stable_mosaic.version = 11 : i64} {
  func.func @_se_conv1x1_kernel(%arg0: memref<320x1xf32, #tpu.memory_space<vmem>>, %arg1: memref<320x196xf32, #tpu.memory_space<vmem>>, %arg2: memref<320x320xbf16, #tpu.memory_space<vmem>>, %arg3: memref<320x196xf32, #tpu.memory_space<vmem>>) attributes {dimension_semantics = [], scalar_prefetch = 0 : i64, scratch_operands = 0 : i64, tpu.core_type = #tpu.core_type<tc>} {
    %c0 = arith.constant 0 : index
    %c0_0 = arith.constant 0 : index
    %0 = vector.load %arg0[%c0, %c0_0] : memref<320x1xf32, #tpu.memory_space<vmem>>, vector<320x1xf32>
    %1 = arith.negf %0 : vector<320x1xf32>
    %2 = math.exp %1 : vector<320x1xf32>
    %cst = arith.constant 1.000000e+00 : f32
    %3 = vector.broadcast %cst : f32 to vector<320x1xf32>
    %4 = arith.addf %3, %2 : vector<320x1xf32>
    %5 = arith.divf %3, %4 : vector<320x1xf32>
    %c0_1 = arith.constant 0 : index
    %c0_2 = arith.constant 0 : index
    %6 = vector.load %arg1[%c0_1, %c0_2] : memref<320x196xf32, #tpu.memory_space<vmem>>, vector<320x196xf32>
    %7 = vector.broadcast %5 : vector<320x1xf32> to vector<320x196xf32>
    %8 = arith.mulf %6, %7 : vector<320x196xf32>
    %c0_3 = arith.constant 0 : index
    %c0_4 = arith.constant 0 : index
    %9 = vector.load %arg2[%c0_3, %c0_4] : memref<320x320xbf16, #tpu.memory_space<vmem>>, vector<320x320xbf16>
    %10 = arith.truncf %8 : vector<320x196xf32> to vector<320x196xbf16>
    %cst_5 = arith.constant dense<0.000000e+00> : vector<320x196xf32>
    %11 = tpu.matmul %9, %10, %cst_5 {dimension_numbers = #tpu.dot_dimension_numbers<[1], [0], [0], [1], [0, 0, 1, 1], [], []>} : vector<320x320xbf16>, vector<320x196xbf16>, vector<320x196xf32> -> vector<320x196xf32>
    %c0_6 = arith.constant 0 : index
    %c0_7 = arith.constant 0 : index
    %12 = vector.load %arg3[%c0_6, %c0_7] : memref<320x196xf32, #tpu.memory_space<vmem>>, vector<320x196xf32>
    tpu.vector_store %arg3[%c0_6, %c0_7], %11 {strides = array<i32>} : memref<320x196xf32, #tpu.memory_space<vmem>>, vector<320x196xf32>,
    return
  }
}

</mosaic_0001>

<bundles_post_ra>
// kernel: se_scale_conv1x1.1
= control target key start
LH: loop header
LB: loop body
LE: loop exit
PB: predicated region body
PF: predicated region fallthrough
CT: control target
= control target key end

     0   :  { %v2951_v0 = vmov 0   ;;  %s5346_s0 = inlined_call_operand.vmem [shape: f32[320,1], index: 0, kind: input, shape index: {}]   ;;  %s5347_s1 = inlined_call_operand.vmem [shape: f32[320,196], index: 1, kind: input, shape index: {}]   ;;  %s5348_s2 = inlined_call_operand.vmem [shape: bf16[320,320], index: 2, kind: input, shape index: {}]   ;;  %s5349_s3 = inlined_call_operand.vmem [shape: f32[320,196], index: 3, kind: output, shape index: {}]  }
   0x1   :  { %2790 = vset.pattern.permute.xlu2 %v2951_v0  ;;  %2789 = vset.pattern.permute.xlu1 %v2951_v0  ;;  %v53_v1 = vld [vmem:[%s5346_s0 + $0x130] sm:$0xff]  ;;  %v51_v2 = vld [vmem:[%s5346_s0 + $0x120] sm:$0xff]  ;;  %v54_v7 = vld [vmem:[%s5346_s0 + $0x138] sm:$0xff] }
   0x2   :  { %v29_v3 = vld [vmem:[%s5346_s0 + $0x70] sm:$0xff]  ;;  %2788 = vset.pattern.permute.xlu0 %v2951_v0  ;;  %v2433_v4 = vmul.f32 -1.442695, %v53_v1  ;;  %v2431_v5 = vmul.f32 -1.442695, %v51_v2  ;;  %v52_v8 = vld [vmem:[%s5346_s0 + $0x128] sm:$0xff] }
   0x3   :  { %v2409_v6 = vmul.f32 -1.442695, %v29_v3  ;;  %v30_v9 = vld [vmem:[%s5346_s0 + $0x78] sm:$0xff]  ;;  %v2434_v10 = vmul.f32 -1.442695, %v54_v7  ;;  %v49_v14 = vld [vmem:[%s5346_s0 + $0x110] sm:$0xff] }
   0x4   :  { %2791 = vpow2.f32 %v2433_v4  ;;  %v2432_v11 = vmul.f32 -1.442695, %v52_v8  ;;  %v2410_v12 = vmul.f32 -1.442695, %v30_v9  ;;  %v50_v13 = vld [vmem:[%s5346_s0 + $0x118] sm:$0xff]  ;;  %v27_v17 = vld [vmem:[%s5346_s0 + $0x60] sm:$0xff] }
   0x5   :  { %2793 = vpow2.f32 %v2431_v5  ;;  %v2430_v15 = vmul.f32 -1.442695, %v50_v13  ;;  %v2429_v16 = vmul.f32 -1.442695, %v49_v14  ;;  %v2407_v23 = vmul.f32 -1.442695, %v27_v17 }
   0x6   :  { %2795 = vpow2.f32 %v2409_v6  ;;  %v47_v25 = vld [vmem:[%s5346_s0 + $0x100] sm:$0xff]  ;;  %v48_v39 = vld [vmem:[%s5346_s0 + $0x108] sm:$0xff] }
   0x7   :  { %2797 = vpow2.f32 %v2434_v10  ;;  %v3018_v35 = vmul.f32 -1.442695, %v47_v25 }
   0x8   :  { %2799 = vpow2.f32 %v2432_v11 }
   0x9   :  { %2801 = vpow2.f32 %v2410_v12 }
   0xa   :  { %v2792_v18 = vpop.eup %2791  ;;  %2803 = vpow2.f32 %v2430_v15 }
   0xb   :  { %v2794_v19 = vpop.eup %2793  ;;  %v2999_v20 = vadd.f32 1.0, %v2792_v18  ;;  %2805 = vpow2.f32 %v2429_v16 }
   0xc   :  { %v2796_v21 = vpop.eup %2795  ;;  %v3001_v22 = vadd.f32 1.0, %v2794_v19 }
   0xd   :  { %v2798_v24 = vpop.eup %2797  ;;  %2807 = vrcp.f32 %v2999_v20  ;;  %v794_v27 = vand.u32 2147483647, %v2999_v20  ;;  %v796_v28 = vand.u32 2147483648, %v2999_v20  ;;  %v3012_v32 = vadd.f32 1.0, %v2796_v21 }
   0xe   :  { %v2800_v26 = vpop.eup %2799  ;;  %2809 = vrcp.f32 %v3001_v22  ;;  %v764_v30 = vand.u32 2147483647, %v3001_v22  ;;  %v766_v31 = vand.u32 2147483648, %v3001_v22  ;;  %v3014_v33 = vadd.f32 1.0, %v2798_v24 }
   0xf   :  { %v2802_v29 = vpop.eup %2801  ;;  %v3016_v34 = vadd.f32 1.0, %v2800_v26  ;;  %2811 = vpow2.f32 %v2407_v23  ;;  %vm790_vm0 = vweird.f32 %v2999_v20  ;;  %vm760_vm1 = vweird.f32 %v3001_v22 }
  0x10   :  { %v2804_v36 = vpop.eup %2803  ;;  %2813 = vrcp.f32 %v3012_v32  ;;  %v436_v37 = vand.u32 2147483648, %v3012_v32  ;;  %vm3024_vm2 = vcmp.eq.f32.partialorder %v794_v27, 8.507059e+37  ;;  %v797_v40 = vor.u32 1.1754944e-38, %v796_v28 }
  0x11   :  { %v2806_v38 = vpop.eup %2805  ;;  %v434_v41 = vand.u32 2147483647, %v3012_v32  ;;  %2815 = vrcp.f32 %v3014_v33  ;;  %v3030_v42 = vadd.f32 1.0, %v2802_v29  ;;  %vm3032_vm3 = vcmp.eq.f32.partialorder %v764_v30, 8.507059e+37 }
  0x12   :  { %v767_v45 = vor.u32 1.1754944e-38, %v766_v31  ;;  %v811_v46 = vand.u32 2147483648, %v3014_v33  ;;  %2817 = vrcp.f32 %v3016_v34  ;;  %vm430_vm4 = vweird.f32 %v3012_v32 }
  0x13   :  { %v2808_v43 = vpop.eup %2807  ;;  %vm805_vm5 = vweird.f32 %v3014_v33  ;;  %v809_v49 = vand.u32 2147483647, %v3014_v33  ;;  %v3043_v51 = vor.u32 1.1754944e-38, %v436_v37  ;;  %v779_v52 = vand.u32 2147483647, %v3016_v34 }
  0x14   :  { %v2810_v47 = vpop.eup %2809  ;;  %v786_v48 = vmul.f32 %v2808_v43, %v2999_v20  ;;  %v781_v53 = vand.u32 2147483648, %v3016_v34  ;;  %vm791_vm6 = vweird.f32 %v2808_v43  ;;  %vm3047_vm7 = vcmp.eq.f32.partialorder %v434_v41, 8.507059e+37 }
  0x15   :  { %v756_v50 = vmul.f32 %v2810_v47, %v3001_v22  ;;  %v2812_v54 = vpop.eup %2811  ;;  %vm775_vm8 = vweird.f32 %v3016_v34  ;;  %2819 = vrcp.f32 %v3030_v42  ;;  %vm761_vm9 = vweird.f32 %v2810_v47  ;;  %vm3063_vm12 = vmor %vm790_vm0, %vm791_vm6 }
  0x16   :  { %v787_v55 = vsub.f32 1.0, %v786_v48  ;;  %v2814_v57 = vpop.eup %2813  ;;  %v812_v59 = vor.u32 1.1754944e-38, %v811_v46  ;;  %vm445_vm10 = vweird.f32 %v3030_v42  ;;  %vm3055_vm11 = vcmp.eq.f32.partialorder %v809_v49, 8.507059e+37  ;;  %vm3076_vm15 = vmor %vm760_vm1, %vm761_vm9 }
  0x17   :  { %v757_v58 = vsub.f32 1.0, %v756_v50  ;;  %v2816_v60 = vpop.eup %2815  ;;  %v426_v62 = vmul.f32 %v2814_v57, %v3012_v32  ;;  %v782_v0 = vor.u32 1.1754944e-38, %v781_v53  ;;  %v449_v1 = vand.u32 2147483647, %v3030_v42 }
  0x18   :  { %v788_v61 = vmul.f32 %v2808_v43, %v787_v55  ;;  %v2818_v2 = vpop.eup %2817  ;;  %vm431_vm13 = vweird.f32 %v2814_v57  ;;  %v801_v5 = vmul.f32 %v2816_v60, %v3014_v33  ;;  %vm3068_vm14 = vcmp.eq.f32.partialorder %v779_v52, 8.507059e+37  ;;  %v28_v33 = vld [vmem:[%s5346_s0 + $0x68] sm:$0xff] }
  0x19   :  { %v758_v4 = vmul.f32 %v2810_v47, %v757_v58  ;;  %v451_v7 = vand.u32 2147483648, %v3030_v42  ;;  %v427_v10 = vsub.f32 1.0, %v426_v62  ;;  %vm806_vm0 = vweird.f32 %v2816_v60  ;;  %vm3094_vm1 = vmor %vm430_vm4, %vm431_vm13 }
  0x1a   :  { %v789_v8 = vadd.f32 %v2808_v43, %v788_v61  ;;  %v771_v11 = vmul.f32 %v2818_v2, %v3016_v34  ;;  %v802_v13 = vsub.f32 1.0, %v801_v5  ;;  %vm776_vm6 = vweird.f32 %v2818_v2  ;;  %v23_v61 = vld [vmem:[%s5346_s0 + $0x40] sm:$0xff] }
  0x1b   :  { %v759_v12 = vadd.f32 %v2810_v47, %v758_v4  ;;  %v3081_v14 = vadd.f32 1.0, %v2804_v36  ;;  %v2820_v15 = vpop.eup %2819  ;;  %v428_v17 = vmul.f32 %v2814_v57, %v427_v10  ;;  %v3085_v19 = vadd.f32 1.0, %v2806_v38  ;;  %vm3113_vm4 = vmor %vm775_vm8, %vm776_vm6 }
  0x1c   :  { %v793_v16 = vsel %vm3063_vm12, %v2808_v43, %v789_v8  ;;  %v772_v18 = vsub.f32 1.0, %v771_v11  ;;  %v803_v23 = vmul.f32 %v2816_v60, %v802_v13  ;;  %v441_v24 = vmul.f32 %v2820_v15, %v3030_v42  ;;  %v26_v42 = vld [vmem:[%s5346_s0 + $0x58] sm:$0xff] }
  0x1d   :  { %v798_v20 = vsel %vm3024_vm2, %v797_v40, %v793_v16  ;;  %v763_v21 = vsel %vm3076_vm15, %v2810_v47, %v759_v12  ;;  %v429_v26 = vadd.f32 %v2814_v57, %v428_v17  ;;  %vm3104_vm2 = vmor %vm805_vm5, %vm806_vm0  ;;  %v3108_v29 = vadd.f32 1.0, %v2812_v54 }
  0x1e   :  { %1087 = vperm.xlu0 %2788, %v798_v20   ;;  %v768_v25 = vsel %vm3032_vm3, %v767_v45, %v763_v21  ;;  %v773_v28 = vmul.f32 %v2818_v2, %v772_v18  ;;  %v804_v30 = vadd.f32 %v2816_v60, %v803_v23  ;;  %v442_v32 = vsub.f32 1.0, %v441_v24  ;;  %v21_v21 = vld [vmem:[%s5346_s0 + $0x30] sm:$0xff] }
  0x1f   :  { %1077 = vperm.xlu1 %2789, %v768_v25   ;;  %vm446_vm3 = vweird.f32 %v2820_v15  ;;  %2821 = vrcp.f32 %v3081_v14  ;;  %v433_v36 = vsel %vm3094_vm1, %v2814_v57, %v429_v26  ;;  %v749_v38 = vand.u32 2147483647, %v3081_v14 }
  0x20   :  { %v774_v37 = vadd.f32 %v2818_v2, %v773_v28  ;;  %v751_v34 = vand.u32 2147483648, %v3081_v14  ;;  %v438_v40 = vsel %vm3047_vm7, %v3043_v51, %v433_v36  ;;  %v808_v41 = vsel %vm3104_vm2, %v2816_v60, %v804_v30  ;;  %vm3138_vm5 = vmor %vm445_vm10, %vm446_vm3  ;;  %v25_v60 = vld [vmem:[%s5346_s0 + $0x50] sm:$0xff] }
  0x21   :  { %v443_v43 = vmul.f32 %v2820_v15, %v442_v32  ;;  %2823 = vrcp.f32 %v3085_v19  ;;  %967 = vperm.xlu2 %2790, %v438_v40   ;;  %v2408_v46 = vmul.f32 -1.442695, %v28_v33  ;;  %v813_v47 = vsel %vm3055_vm11, %v812_v59, %v808_v41 }
  0x22   :  { %v778_v44 = vsel %vm3113_vm4, %v2818_v2, %v774_v37  ;;  %v452_v49 = vor.u32 1.1754944e-38, %v451_v7  ;;  %v2428_v50 = vmul.f32 -1.442695, %v48_v39  ;;  %vm3146_vm7 = vcmp.eq.f32.partialorder %v449_v1, 8.507059e+37  ;;  %v24_v2 = vld [vmem:[%s5346_s0 + $0x48] sm:$0xff] }
  0x23   :  { %v444_v48 = vadd.f32 %v2820_v15, %v443_v43  ;;  %v783_v51 = vsel %vm3068_vm14, %v782_v0, %v778_v44  ;;  %vm745_vm8 = vweird.f32 %v3081_v14  ;;  %2825 = vrcp.f32 %v3108_v29  ;;  %v20_v37 = vld [vmem:[%s5346_s0 + $0x28] sm:$0xff]  ;;  %v17_v43 = vld [vmem:[%s5346_s0 + $0x10] sm:$0xff] }
  0x24   :  { %vm3157_vm9 = vcmp.eq.f32.partialorder %v749_v38, 8.507059e+37  ;;  %v752_v56 = vor.u32 1.1754944e-38, %v751_v34  ;;  %2827 = vpow2.f32 %v3018_v35  ;;  %vm730_vm10 = vweird.f32 %v3085_v19  ;;  %v19_v38 = vld [vmem:[%s5346_s0 + $0x20] sm:$0xff] }
  0x25   :  { %v2822_v53 = vpop.eup %2821  ;;  %v448_v54 = vsel %vm3138_vm5, %v2820_v15, %v444_v48  ;;  %v734_v58 = vand.u32 2147483647, %v3085_v19  ;;  %v736_v59 = vand.u32 2147483648, %v3085_v19  ;;  %vm400_vm11 = vweird.f32 %v3108_v29 }
  0x26   :  { %1092 = vperm.xlu0 %2788, %v813_v47   ;;  %v741_v57 = vmul.f32 %v2822_v53, %v3081_v14  ;;  %v453_v35 = vsel %vm3146_vm7, %v452_v49, %v448_v54  ;;  %2829 = vpow2.f32 %v2408_v46  ;;  %v2406_v63 = vmul.f32 -1.442695, %v26_v42  ;;  %v22_v14 = vld [vmem:[%s5346_s0 + $0x38] sm:$0xff] }
  0x27   :  { %v2824_v62 = vpop.eup %2823  ;;  %1082 = vperm.xlu1 %2789, %v783_v51   ;;  %vm746_vm12 = vweird.f32 %v2822_v53  ;;  %2831 = vpow2.f32 %v2428_v50  ;;  %v404_v3 = vand.u32 2147483647, %v3108_v29  ;;  %v2405_v4 = vmul.f32 -1.442695, %v25_v60 }
  0x28   :  { %v742_v0 = vsub.f32 1.0, %v741_v57  ;;  %v726_v1 = vmul.f32 %v2824_v62, %v3085_v19  ;;  %2833 = vpow2.f32 %v2406_v63  ;;  %v2403_v5 = vmul.f32 -1.442695, %v23_v61  ;;  %vm3184_vm14 = vmor %vm745_vm8, %vm746_vm12 }
  0x29   :  { %v2826_v6 = vpop.eup %2825  ;;  %972 = vperm.xlu2 %2790, %v453_v35   ;;  %vm731_vm13 = vweird.f32 %v2824_v62  ;;  %v406_v9 = vand.u32 2147483648, %v3108_v29  ;;  %vm3188_vm15 = vcmp.eq.f32.partialorder %v734_v58, 8.507059e+37  ;;  %v737_v13 = vor.u32 1.1754944e-38, %v736_v59 }
  0x2a   :  { %v743_v7 = vmul.f32 %v2822_v53, %v742_v0  ;;  %v727_v8 = vsub.f32 1.0, %v726_v1  ;;  %v2828_v10 = vpop.eup %2827  ;;  %v396_v15 = vmul.f32 %v2826_v6, %v3108_v29  ;;  %v2404_v16 = vmul.f32 -1.442695, %v24_v2  ;;  %vm3204_vm0 = vmor %vm730_vm10, %vm731_vm13 }
  0x2b   :  { %v3193_v20 = vadd.f32 1.0, %v2828_v10  ;;  %2835 = vpow2.f32 %v2405_v4  ;;  %vm401_vm6 = vweird.f32 %v2826_v6  ;;  %vm3208_vm1 = vcmp.eq.f32.partialorder %v404_v3, 8.507059e+37 }
  0x2c   :  { %v744_v17 = vadd.f32 %v2822_v53, %v743_v7  ;;  %v728_v18 = vmul.f32 %v2824_v62, %v727_v8  ;;  %v2830_v22 = vpop.eup %2829  ;;  %v397_v24 = vsub.f32 1.0, %v396_v15  ;;  %2837 = vpow2.f32 %v2403_v5  ;;  %vm3230_vm2 = vmor %vm400_vm11, %vm401_vm6 }
  0x2d   :  { %v2832_v26 = vpop.eup %2831  ;;  %v407_v30 = vor.u32 1.1754944e-38, %v406_v9  ;;  %2839 = vrcp.f32 %v3193_v20  ;;  %v2402_v33 = vmul.f32 -1.442695, %v22_v14  ;;  %v3217_v36 = vmul.f32 -1.442695, %v21_v21 }
  0x2e   :  { %v748_v27 = vsel %vm3184_vm14, %v2822_v53, %v744_v17  ;;  %v729_v28 = vadd.f32 %v2824_v62, %v728_v18  ;;  %v2834_v19 = vpop.eup %2833  ;;  %v398_v32 = vmul.f32 %v2826_v6, %v397_v24  ;;  %v3234_v40 = vadd.f32 1.0, %v2830_v22 }
  0x2f   :  { %v753_v31 = vsel %vm3157_vm9, %v752_v56, %v748_v27  ;;  %v3236_v41 = vadd.f32 1.0, %v2832_v26  ;;  %2841 = vpow2.f32 %v2404_v16  ;;  %v704_v46 = vand.u32 2147483647, %v3193_v20  ;;  %v18_v16 = vld [vmem:[%s5346_s0 + $0x18] sm:$0xff] }
  0x30   :  { %1072 = vperm.xlu1 %2789, %v753_v31   ;;  %v733_v34 = vsel %vm3204_vm0, %v2824_v62, %v729_v28  ;;  %v399_v45 = vadd.f32 %v2826_v6, %v398_v32  ;;  %v3244_v29 = vadd.f32 1.0, %v2834_v19  ;;  %v706_v48 = vand.u32 2147483648, %v3193_v20 }
  0x31   :  { %v738_v44 = vsel %vm3188_vm15, %v737_v13, %v733_v34  ;;  %v2836_v47 = vpop.eup %2835  ;;  %2843 = vrcp.f32 %v3234_v40  ;;  %v3248_v49 = vmul.f32 -1.442695, %v20_v37  ;;  %v3250_v50 = vmul.f32 -1.442695, %v19_v38  ;;  %v45_v13 = vld [vmem:[%s5346_s0 + $0xf0] sm:$0xff] }
  0x32   :  { %1067 = vperm.xlu0 %2788, %v738_v44   ;;  %v2838_v51 = vpop.eup %2837  ;;  %v403_v52 = vsel %vm3230_vm2, %v2826_v6, %v399_v45  ;;  %v419_v42 = vand.u32 2147483647, %v3234_v40  ;;  %2845 = vrcp.f32 %v3236_v41  ;;  %v3256_v53 = vmul.f32 -1.442695, %v17_v43 }
  0x33   :  { %v2840_v54 = vpop.eup %2839  ;;  %v408_v55 = vsel %vm3208_vm1, %v407_v30, %v403_v52  ;;  %v421_v56 = vand.u32 2147483648, %v3234_v40  ;;  %v719_v57 = vand.u32 2147483647, %v3236_v41  ;;  %v721_v58 = vand.u32 2147483648, %v3236_v41 }
  0x34   :  { %957 = vperm.xlu2 %2790, %v408_v55   ;;  %v696_v59 = vmul.f32 %v2840_v54, %v3193_v20  ;;  %vm700_vm4 = vweird.f32 %v3193_v20  ;;  %vm3265_vm3 = vcmp.eq.f32.partialorder %v704_v46, 8.507059e+37  ;;  %2847 = vrcp.f32 %v3244_v29 }
  0x35   :  { %v2842_v61 = vpop.eup %2841  ;;  %v707_v62 = vor.u32 1.1754944e-38, %v706_v48  ;;  %vm415_vm5 = vweird.f32 %v3234_v40  ;;  %vm715_vm7 = vweird.f32 %v3236_v41  ;;  %v389_v35 = vand.u32 2147483647, %v3244_v29 }
  0x36   :  { %v697_v63 = vsub.f32 1.0, %v696_v59  ;;  %vm701_vm8 = vweird.f32 %v2840_v54  ;;  %vm3273_vm9 = vcmp.eq.f32.partialorder %v419_v42, 8.507059e+37  ;;  %v3277_v1 = vadd.f32 1.0, %v2836_v47 }
  0x37   :  { %v3279_v2 = vadd.f32 1.0, %v2838_v51  ;;  %v2844_v3 = vpop.eup %2843  ;;  %v422_v4 = vor.u32 1.1754944e-38, %v421_v56  ;;  %vm3281_vm10 = vcmp.eq.f32.partialorder %v719_v57, 8.507059e+37  ;;  %v722_v6 = vor.u32 1.1754944e-38, %v721_v58  ;;  %vm3291_vm12 = vmor %vm700_vm4, %vm701_vm8 }
  0x38   :  { %vm385_vm11 = vweird.f32 %v3244_v29  ;;  %v2846_v7 = vpop.eup %2845  ;;  %v698_v8 = vmul.f32 %v2840_v54, %v697_v63  ;;  %v411_v9 = vmul.f32 %v2844_v3, %v3234_v40  ;;  %v391_v10 = vand.u32 2147483648, %v3244_v29 }
  0x39   :  { %2849 = vrcp.f32 %v3277_v1  ;;  %v711_v12 = vmul.f32 %v2846_v7, %v3236_v41  ;;  %vm3296_vm13 = vcmp.eq.f32.partialorder %v389_v35, 8.507059e+37  ;;  %v3300_v15 = vadd.f32 1.0, %v2842_v61 }
  0x3a   :  { %2851 = vpow2.f32 %v2402_v33  ;;  %v2848_v17 = vpop.eup %2847  ;;  %v699_v18 = vadd.f32 %v2840_v54, %v698_v8  ;;  %v412_v20 = vsub.f32 1.0, %v411_v9  ;;  %vm416_vm14 = vweird.f32 %v2844_v3  ;;  %v15_v9 = vld [vmem:[%s5346_s0] sm:$0xff] }
  0x3b   :  { %2853 = vrcp.f32 %v3279_v2  ;;  %v712_v14 = vsub.f32 1.0, %v711_v12  ;;  %vm716_vm15 = vweird.f32 %v2846_v7  ;;  %v381_v21 = vmul.f32 %v2848_v17, %v3244_v29  ;;  %vm3316_vm0 = vmor %vm415_vm5, %vm416_vm14 }
  0x3c   :  { %v374_v22 = vand.u32 2147483647, %v3277_v1  ;;  %v703_v23 = vsel %vm3291_vm12, %v2840_v54, %v699_v18  ;;  %v413_v24 = vmul.f32 %v2844_v3, %v412_v20  ;;  %v392_v25 = vor.u32 1.1754944e-38, %v391_v10  ;;  %vm3323_vm1 = vmor %vm715_vm7, %vm716_vm15 }
  0x3d   :  { %v3310_v26 = vmul.f32 -1.442695, %v18_v16  ;;  %v708_v27 = vsel %vm3265_vm3, %v707_v62, %v703_v23  ;;  %v713_v30 = vmul.f32 %v2846_v7, %v712_v14  ;;  %v382_v19 = vsub.f32 1.0, %v381_v21 }
  0x3e   :  { %vm386_vm6 = vweird.f32 %v2848_v17  ;;  %1057 = vperm.xlu1 %2789, %v708_v27   ;;  %v414_v32 = vadd.f32 %v2844_v3, %v413_v24  ;;  %vm370_vm2 = vweird.f32 %v3277_v1  ;;  %v376_v37 = vand.u32 2147483648, %v3277_v1 }
  0x3f   :  { %v2850_v31 = vpop.eup %2849  ;;  %2855 = vrcp.f32 %v3300_v15  ;;  %v714_v34 = vadd.f32 %v2846_v7, %v713_v30  ;;  %v383_v39 = vmul.f32 %v2848_v17, %v382_v19  ;;  %vm3331_vm4 = vcmp.eq.f32.partialorder %v374_v22, 8.507059e+37  ;;  %vm3340_vm3 = vmor %vm385_vm11, %vm386_vm6  ;;  %v43_v30 = vld [vmem:[%s5346_s0 + $0xe0] sm:$0xff] }
  0x40   :  { %v2852_v38 = vpop.eup %2851  ;;  %v366_v40 = vmul.f32 %v2850_v31, %v3277_v1  ;;  %v418_v44 = vsel %vm3316_vm0, %v2844_v3, %v414_v32  ;;  %vm371_vm5 = vweird.f32 %v2850_v31  ;;  %v344_v46 = vand.u32 2147483647, %v3279_v2  ;;  %v16_v1 = vld [vmem:[%s5346_s0 + $0x8] sm:$0xff] }
  0x41   :  { %v2854_v41 = vpop.eup %2853  ;;  %v346_v47 = vand.u32 2147483648, %v3279_v2  ;;  %v423_v48 = vsel %vm3273_vm9, %v422_v4, %v418_v44  ;;  %v718_v51 = vsel %vm3323_vm1, %v2846_v7, %v714_v34  ;;  %v384_v52 = vadd.f32 %v2848_v17, %v383_v39  ;;  %vm3364_vm9 = vmor %vm370_vm2, %vm371_vm5 }
  0x42   :  { %v367_v42 = vsub.f32 1.0, %v366_v40  ;;  %962 = vperm.xlu0 %2788, %v423_v48   ;;  %v723_v29 = vsel %vm3281_vm10, %v722_v6, %v718_v51  ;;  %v377_v54 = vor.u32 1.1754944e-38, %v376_v37  ;;  %v336_v55 = vmul.f32 %v2854_v41, %v3279_v2 }
  0x43   :  { %vm340_vm7 = vweird.f32 %v3279_v2  ;;  %1062 = vperm.xlu2 %2790, %v723_v29   ;;  %v388_v56 = vsel %vm3340_vm3, %v2848_v17, %v384_v52  ;;  %vm355_vm8 = vweird.f32 %v3300_v15  ;;  %v3357_v58 = vadd.f32 1.0, %v2852_v38  ;;  %v46_v38 = vld [vmem:[%s5346_s0 + $0xf8] sm:$0xff] }
  0x44   :  { %v368_v57 = vmul.f32 %v2850_v31, %v367_v42  ;;  %v393_v60 = vsel %vm3296_vm13, %v392_v25, %v388_v56  ;;  %v337_v62 = vsub.f32 1.0, %v336_v55  ;;  %vm341_vm10 = vweird.f32 %v2854_v41 }
  0x45   :  { %v2856_v59 = vpop.eup %2855  ;;  %2857 = vpow2.f32 %v3217_v36  ;;  %vm3369_vm11 = vcmp.eq.f32.partialorder %v344_v46, 8.507059e+37  ;;  %v347_v0 = vor.u32 1.1754944e-38, %v346_v47  ;;  %v359_v5 = vand.u32 2147483647, %v3300_v15  ;;  %vm3384_vm12 = vmor %vm340_vm7, %vm341_vm10 }
  0x46   :  { %v369_v35 = vadd.f32 %v2850_v31, %v368_v57  ;;  %v351_v3 = vmul.f32 %v2856_v59, %v3300_v15  ;;  %952 = vperm.xlu1 %2789, %v393_v60   ;;  %v338_v4 = vmul.f32 %v2854_v41, %v337_v62  ;;  %v361_v6 = vand.u32 2147483648, %v3300_v15 }
  0x47   :  { %2859 = vrcp.f32 %v3357_v58  ;;  %vm356_vm13 = vweird.f32 %v2856_v59  ;;  %v2396_v12 = vmul.f32 -1.442695, %v16_v1  ;;  %v329_v18 = vand.u32 2147483647, %v3357_v58 }
  0x48   :  { %v373_v36 = vsel %vm3364_vm9, %v2850_v31, %v369_v35  ;;  %v352_v8 = vsub.f32 1.0, %v351_v3  ;;  %2861 = vpow2.f32 %v3248_v49  ;;  %v339_v11 = vadd.f32 %v2854_v41, %v338_v4  ;;  %vm3403_vm14 = vmor %vm355_vm8, %vm356_vm13 }
  0x49   :  { %v378_v10 = vsel %vm3331_vm4, %v377_v54, %v373_v36  ;;  %2863 = vpow2.f32 %v3250_v50  ;;  %v362_v50 = vor.u32 1.1754944e-38, %v361_v6  ;;  %v2395_v20 = vmul.f32 -1.442695, %v15_v9 }
  0x4a   :  { %v353_v2 = vmul.f32 %v2856_v59, %v352_v8  ;;  %2865 = vpow2.f32 %v3256_v53  ;;  %947 = vperm.xlu0 %2788, %v378_v10   ;;  %v343_v49 = vsel %vm3384_vm12, %v2854_v41, %v339_v11  ;;  %vm360_vm15 = vcmp.eq.f32.partialorder %v359_v5, 8.507059e+37 }
  0x4b   :  { %v2858_v16 = vpop.eup %2857  ;;  %v348_v53 = vsel %vm3369_vm11, %v347_v0, %v343_v49  ;;  %2867 = vpow2.f32 %v3310_v26  ;;  %v2425_v15 = vmul.f32 -1.442695, %v45_v13  ;;  %v331_v27 = vand.u32 2147483648, %v3357_v58 }
  0x4c   :  { %v354_v14 = vadd.f32 %v2856_v59, %v353_v2  ;;  %v3410_v21 = vadd.f32 1.0, %v2858_v16  ;;  %937 = vperm.xlu2 %2790, %v348_v53   ;;  %2869 = vpow2.f32 %v2396_v12  ;;  %vm325_vm0 = vweird.f32 %v3357_v58 }
  0x4d   :  { %v2860_v22 = vpop.eup %2859  ;;  %vm3419_vm1 = vcmp.eq.f32.partialorder %v329_v18, 8.507059e+37  ;;  %v332_v44 = vor.u32 1.1754944e-38, %v331_v27  ;;  %v2423_v45 = vmul.f32 -1.442695, %v43_v30  ;;  %v3448_v51 = vmul.f32 -1.442695, %v46_v38 }
  0x4e   :  { %v2862_v23 = vpop.eup %2861  ;;  %v358_v24 = vsel %vm3403_vm14, %v2856_v59, %v354_v14  ;;  %v321_v25 = vmul.f32 %v2860_v22, %v3357_v58  ;;  %2871 = vrcp.f32 %v3410_v21  ;;  %vm326_vm6 = vweird.f32 %v2860_v22 }
  0x4f   :  { %v2864_v28 = vpop.eup %2863  ;;  %2873 = vpow2.f32 %v2395_v20  ;;  %v363_v31 = vsel %vm360_vm15, %v362_v50, %v358_v24  ;;  %v3426_v33 = vadd.f32 1.0, %v2862_v23  ;;  %v314_v34 = vand.u32 2147483647, %v3410_v21  ;;  %vm3441_vm2 = vmor %vm325_vm0, %vm326_vm6 }
  0x50   :  { %v2866_v19 = vpop.eup %2865  ;;  %v322_v32 = vsub.f32 1.0, %v321_v25  ;;  %v3428_v37 = vadd.f32 1.0, %v2864_v28  ;;  %v316_v39 = vand.u32 2147483648, %v3410_v21  ;;  %2875 = vpow2.f32 %v2425_v15 }
  0x51   :  { %v3435_v40 = vadd.f32 1.0, %v2866_v19  ;;  %v2868_v43 = vpop.eup %2867  ;;  %2877 = vrcp.f32 %v3426_v33  ;;  %vm310_vm4 = vweird.f32 %v3410_v21  ;;  %v301_v48 = vand.u32 2147483648, %v3426_v33 }
  0x52   :  { %v323_v41 = vmul.f32 %v2860_v22, %v322_v32  ;;  %v2870_v46 = vpop.eup %2869  ;;  %942 = vperm.xlu0 %2788, %v363_v31   ;;  %2879 = vrcp.f32 %v3428_v37  ;;  %v284_v29 = vand.u32 2147483647, %v3428_v37  ;;  %v286_v54 = vand.u32 2147483648, %v3428_v37 }
  0x53   :  { %2881 = vrcp.f32 %v3435_v40  ;;  %vm3454_vm3 = vcmp.eq.f32.partialorder %v314_v34, 8.507059e+37  ;;  %v317_v58 = vor.u32 1.1754944e-38, %v316_v39  ;;  %v299_v59 = vand.u32 2147483647, %v3426_v33 }
  0x54   :  { %v2872_v52 = vpop.eup %2871  ;;  %v324_v42 = vadd.f32 %v2860_v22, %v323_v41  ;;  %vm295_vm5 = vweird.f32 %v3426_v33  ;;  %vm280_vm7 = vweird.f32 %v3428_v37  ;;  %2883 = vpow2.f32 %v2423_v45 }
  0x55   :  { %v2874_v55 = vpop.eup %2873  ;;  %v306_v56 = vmul.f32 %v2872_v52, %v3410_v21  ;;  %vm311_vm8 = vweird.f32 %v2872_v52  ;;  %v3465_v63 = vadd.f32 1.0, %v2868_v43  ;;  %v302_v3 = vor.u32 1.1754944e-38, %v301_v48 }
  0x56   :  { %v328_v60 = vsel %vm3441_vm2, %v2860_v22, %v324_v42  ;;  %v2876_v61 = vpop.eup %2875  ;;  %vm3469_vm9 = vcmp.eq.f32.partialorder %v284_v29, 8.507059e+37  ;;  %v287_v4 = vor.u32 1.1754944e-38, %v286_v54  ;;  %v3473_v5 = vadd.f32 1.0, %v2870_v46  ;;  %vm3486_vm12 = vmor %vm310_vm4, %vm311_vm8 }
  0x57   :  { %v333_v62 = vsel %vm3419_vm1, %v332_v44, %v328_v60  ;;  %v307_v35 = vsub.f32 1.0, %v306_v56  ;;  %v3467_v0 = vpop.eup %2877  ;;  %vm3477_vm10 = vcmp.eq.f32.partialorder %v299_v59, 8.507059e+37  ;;  %vm250_vm11 = vweird.f32 %v3435_v40 }
  0x58   :  { %932 = vperm.xlu2 %2790, %v333_v62   ;;  %v2880_v6 = vpop.eup %2879  ;;  %v291_v7 = vmul.f32 %v3467_v0, %v3426_v33  ;;  %v254_v9 = vand.u32 2147483647, %v3435_v40  ;;  %v256_v2 = vand.u32 2147483648, %v3435_v40  ;;  %2885 = vrcp.f32 %v3465_v63 }
  0x59   :  { %v308_v36 = vmul.f32 %v2872_v52, %v307_v35  ;;  %v2882_v10 = vpop.eup %2881  ;;  %v276_v12 = vmul.f32 %v2880_v6, %v3428_v37  ;;  %v3493_v13 = vadd.f32 1.0, %v2874_v55  ;;  %vm296_vm13 = vweird.f32 %v3467_v0 }
  0x5a   :  { %v292_v49 = vsub.f32 1.0, %v291_v7  ;;  %v246_v17 = vmul.f32 %v2882_v10, %v3435_v40  ;;  %v2884_v50 = vpop.eup %2883  ;;  %vm281_vm14 = vweird.f32 %v2880_v6  ;;  %vm251_vm15 = vweird.f32 %v2882_v10  ;;  %vm3506_vm0 = vmor %vm295_vm5, %vm296_vm13 }
  0x5b   :  { %v309_v16 = vadd.f32 %v2872_v52, %v308_v36  ;;  %v277_v18 = vsub.f32 1.0, %v276_v12  ;;  %2887 = vrcp.f32 %v3473_v5  ;;  %v269_v21 = vand.u32 2147483647, %v3465_v63  ;;  %vm3519_vm1 = vmor %vm280_vm7, %vm281_vm14  ;;  %v42_v36 = vld [vmem:[%s5346_s0 + $0xd8] sm:$0xff]  ;;  %v41_v12 = vld [vmem:[%s5346_s0 + $0xd0] sm:$0xff] }
  0x5c   :  { %v293_v53 = vmul.f32 %v3467_v0, %v292_v49  ;;  %v247_v14 = vsub.f32 1.0, %v246_v17  ;;  %vm3510_vm6 = vcmp.eq.f32.partialorder %v254_v9, 8.507059e+37  ;;  %v3514_v25 = vadd.f32 1.0, %v2876_v61  ;;  %vm3527_vm4 = vmor %vm250_vm11, %vm251_vm15 }
  0x5d   :  { %v313_v20 = vsel %vm3486_vm12, %v2872_v52, %v309_v16  ;;  %v278_v23 = vmul.f32 %v2880_v6, %v277_v18  ;;  %v257_v30 = vor.u32 1.1754944e-38, %v256_v2  ;;  %vm265_vm2 = vweird.f32 %v3465_v63  ;;  %v39_v2 = vld [vmem:[%s5346_s0 + $0xc0] sm:$0xff] }
  0x5e   :  { %v318_v22 = vsel %vm3454_vm3, %v317_v58, %v313_v20  ;;  %v294_v27 = vadd.f32 %v3467_v0, %v293_v53  ;;  %v248_v26 = vmul.f32 %v2882_v10, %v247_v14  ;;  %v2886_v19 = vpop.eup %2885  ;;  %v271_v33 = vand.u32 2147483648, %v3465_v63 }
  0x5f   :  { %927 = vperm.xlu1 %2789, %v318_v22   ;;  %v279_v31 = vadd.f32 %v2880_v6, %v278_v23  ;;  %vm235_vm3 = vweird.f32 %v3473_v5  ;;  %2889 = vrcp.f32 %v3493_v13  ;;  %v261_v34 = vmul.f32 %v2886_v19, %v3465_v63 }
  0x60   :  { %v298_v37 = vsel %vm3506_vm0, %v3467_v0, %v294_v27  ;;  %v249_v38 = vadd.f32 %v2882_v10, %v248_v26  ;;  %vm3538_vm5 = vcmp.eq.f32.partialorder %v269_v21, 8.507059e+37  ;;  %vm266_vm7 = vweird.f32 %v2886_v19 }
  0x61   :  { %v2888_v40 = vpop.eup %2887  ;;  %v283_v43 = vsel %vm3519_vm1, %v2880_v6, %v279_v31  ;;  %v239_v41 = vand.u32 2147483647, %v3473_v5  ;;  %v241_v44 = vand.u32 2147483648, %v3473_v5  ;;  %v262_v47 = vsub.f32 1.0, %v261_v34 }
  0x62   :  { %v288_v45 = vsel %vm3469_vm9, %v287_v4, %v283_v43  ;;  %v253_v46 = vsel %vm3527_vm4, %v2882_v10, %v249_v38  ;;  %v231_v48 = vmul.f32 %v2888_v40, %v3473_v5  ;;  %v303_v52 = vsel %vm3477_vm10, %v302_v3, %v298_v37  ;;  %vm3560_vm9 = vmor %vm265_vm2, %vm266_vm7  ;;  %v44_v3 = vld [vmem:[%s5346_s0 + $0xe8] sm:$0xff]  ;;  %v38_v43 = vld [vmem:[%s5346_s0 + $0xb8] sm:$0xff] }
  0x63   :  { %917 = vperm.xlu0 %2788, %v288_v45   ;;  %v258_v42 = vsel %vm3510_vm6, %v257_v30, %v253_v46  ;;  %v272_v29 = vor.u32 1.1754944e-38, %v271_v33  ;;  %v224_v54 = vand.u32 2147483647, %v3493_v13  ;;  %v263_v55 = vmul.f32 %v2886_v19, %v262_v47  ;;  %v36_v47 = vld [vmem:[%s5346_s0 + $0xa8] sm:$0xff] }
  0x64   :  { %907 = vperm.xlu2 %2790, %v258_v42   ;;  %v232_v56 = vsub.f32 1.0, %v231_v48  ;;  %vm236_vm8 = vweird.f32 %v2888_v40  ;;  %2891 = vrcp.f32 %v3514_v25  ;;  %vm3564_vm10 = vcmp.eq.f32.partialorder %v239_v41, 8.507059e+37 }
  0x65   :  { %v2890_v57 = vpop.eup %2889  ;;  %vm220_vm11 = vweird.f32 %v3493_v13  ;;  %v226_v60 = vand.u32 2147483648, %v3493_v13  ;;  %v3570_v61 = vadd.f32 1.0, %v2884_v50  ;;  %v264_v62 = vadd.f32 %v2886_v19, %v263_v55  ;;  %vm3578_vm12 = vmor %vm235_vm3, %vm236_vm8 }
  0x66   :  { %v233_v35 = vmul.f32 %v2888_v40, %v232_v56  ;;  %v242_v0 = vor.u32 1.1754944e-38, %v241_v44  ;;  %v216_v63 = vmul.f32 %v2890_v57, %v3493_v13  ;;  %vm3582_vm13 = vcmp.eq.f32.partialorder %v224_v54, 8.507059e+37  ;;  %v40_v13 = vld [vmem:[%s5346_s0 + $0xc8] sm:$0xff] }
  0x67   :  { %922 = vperm.xlu1 %2789, %v303_v52   ;;  %vm670_vm14 = vweird.f32 %v3514_v25  ;;  %v676_v6 = vand.u32 2147483648, %v3514_v25  ;;  %2893 = vrcp.f32 %v3570_v61  ;;  %v268_v5 = vsel %vm3560_vm9, %v2886_v19, %v264_v62 }
  0x68   :  { %v234_v7 = vadd.f32 %v2888_v40, %v233_v35  ;;  %v217_v8 = vsub.f32 1.0, %v216_v63  ;;  %vm221_vm15 = vweird.f32 %v2890_v57  ;;  %v273_v9 = vsel %vm3538_vm5, %v272_v29, %v268_v5 }
  0x69   :  { %v227_v10 = vor.u32 1.1754944e-38, %v226_v60  ;;  %2895 = vpow2.f32 %v3448_v51  ;;  %v2424_v11 = vmul.f32 -1.442695, %v44_v3  ;;  %v674_v50 = vand.u32 2147483647, %v3514_v25  ;;  %v37_v51 = vld [vmem:[%s5346_s0 + $0xb0] sm:$0xff]  ;;  %vm3614_vm0 = vmor %vm220_vm11, %vm221_vm15 }
  0x6a   :  { %v2892_v16 = vpop.eup %2891  ;;  %v238_v49 = vsel %vm3578_vm12, %v2888_v40, %v234_v7  ;;  %v218_v17 = vmul.f32 %v2890_v57, %v217_v8  ;;  %v2422_v18 = vmul.f32 -1.442695, %v42_v36  ;;  %v677_v21 = vor.u32 1.1754944e-38, %v676_v6 }
  0x6b   :  { %912 = vperm.xlu0 %2788, %v273_v9   ;;  %v243_v20 = vsel %vm3564_vm10, %v242_v0, %v238_v49  ;;  %v666_v14 = vmul.f32 %v2892_v16, %v3514_v25  ;;  %v644_v22 = vand.u32 2147483647, %v3570_v61  ;;  %2897 = vpow2.f32 %v2424_v11 }
  0x6c   :  { %902 = vperm.xlu2 %2790, %v243_v20   ;;  %v219_v15 = vadd.f32 %v2890_v57, %v218_v17  ;;  %v2421_v23 = vmul.f32 -1.442695, %v41_v12  ;;  %v2419_v24 = vmul.f32 -1.442695, %v39_v2  ;;  %vm671_vm6 = vweird.f32 %v2892_v16 }
  0x6d   :  { %v2894_v27 = vpop.eup %2893  ;;  %v667_v28 = vsub.f32 1.0, %v666_v14  ;;  %2899 = vpow2.f32 %v2422_v18  ;;  %v2417_v26 = vmul.f32 -1.442695, %v37_v51  ;;  %v646_v31 = vand.u32 2147483648, %v3570_v61  ;;  %vm3632_vm2 = vmor %vm670_vm14, %vm671_vm6 }
  0x6e   :  { %v223_v30 = vsel %vm3614_vm0, %v2890_v57, %v219_v15  ;;  %v636_v19 = vmul.f32 %v2894_v27, %v3570_v61  ;;  %2901 = vpow2.f32 %v2421_v23  ;;  %vm640_vm1 = vweird.f32 %v3570_v61 }
  0x6f   :  { %v2896_v32 = vpop.eup %2895  ;;  %v228_v33 = vsel %vm3582_vm13, %v227_v10, %v223_v30  ;;  %v668_v37 = vmul.f32 %v2892_v16, %v667_v28  ;;  %2903 = vpow2.f32 %v2419_v24  ;;  %vm641_vm4 = vweird.f32 %v2894_v27 }
  0x70   :  { %897 = vperm.xlu1 %2789, %v228_v33   ;;  %v637_v34 = vsub.f32 1.0, %v636_v19  ;;  %v3636_v39 = vadd.f32 1.0, %v2896_v32  ;;  %v2420_v40 = vmul.f32 -1.442695, %v40_v13  ;;  %vm675_vm3 = vcmp.eq.f32.partialorder %v674_v50, 8.507059e+37  ;;  %vm3654_vm7 = vmor %vm640_vm1, %vm641_vm4 }
  0x71   :  { %v669_v41 = vadd.f32 %v2892_v16, %v668_v37  ;;  %2905 = vpow2.f32 %v2417_v26  ;;  %v2898_v44 = vpop.eup %2897  ;;  %vm3641_vm5 = vcmp.eq.f32.partialorder %v644_v22, 8.507059e+37  ;;  %v647_v46 = vor.u32 1.1754944e-38, %v646_v31 }
  0x72   :  { %v638_v45 = vmul.f32 %v2894_v27, %v637_v34  ;;  %2907 = vrcp.f32 %v3636_v39  ;;  %v689_v29 = vand.u32 2147483647, %v3636_v39  ;;  %v3659_v54 = vadd.f32 1.0, %v2898_v44 }
  0x73   :  { %v2900_v48 = vpop.eup %2899  ;;  %v673_v52 = vsel %vm3632_vm2, %v2892_v16, %v669_v41  ;;  %v2418_v55 = vmul.f32 -1.442695, %v38_v43  ;;  %2909 = vpow2.f32 %v2420_v40  ;;  %v691_v62 = vand.u32 2147483648, %v3636_v39 }
  0x74   :  { %v2902_v56 = vpop.eup %2901  ;;  %v678_v57 = vsel %vm675_vm3, %v677_v21, %v673_v52  ;;  %v639_v58 = vadd.f32 %v2894_v27, %v638_v45  ;;  %v3661_v59 = vadd.f32 1.0, %v2900_v48  ;;  %2911 = vrcp.f32 %v3659_v54 }
  0x75   :  { %v2904_v60 = vpop.eup %2903  ;;  %1047 = vperm.xlu0 %2788, %v678_v57   ;;  %v3665_v61 = vmul.f32 -1.442695, %v36_v47  ;;  %v659_v0 = vand.u32 2147483647, %v3659_v54  ;;  %v661_v63 = vand.u32 2147483648, %v3659_v54  ;;  %vm685_vm8 = vweird.f32 %v3636_v39 }
  0x76   :  { %v643_v35 = vsel %vm3654_vm7, %v2894_v27, %v639_v58  ;;  %2913 = vrcp.f32 %v3661_v59  ;;  %vm3675_vm9 = vcmp.eq.f32.partialorder %v689_v29, 8.507059e+37  ;;  %v629_v36 = vand.u32 2147483647, %v3661_v59  ;;  %v35_v58 = vld [vmem:[%s5346_s0 + $0xa0] sm:$0xff] }
  0x77   :  { %v2906_v3 = vpop.eup %2905  ;;  %v648_v1 = vsel %vm3641_vm5, %v647_v46, %v643_v35  ;;  %2915 = vpow2.f32 %v2418_v55  ;;  %v631_v5 = vand.u32 2147483648, %v3661_v59  ;;  %v3681_v7 = vadd.f32 1.0, %v2902_v56 }
  0x78   :  { %v2908_v6 = vpop.eup %2907  ;;  %1037 = vperm.xlu2 %2790, %v648_v1   ;;  %v3683_v8 = vadd.f32 1.0, %v2904_v60  ;;  %v692_v10 = vor.u32 1.1754944e-38, %v691_v62  ;;  %vm655_vm10 = vweird.f32 %v3659_v54  ;;  %vm625_vm11 = vweird.f32 %v3661_v59 }
  0x79   :  { %v681_v9 = vmul.f32 %v2908_v6, %v3636_v39  ;;  %v2910_v11 = vpop.eup %2909  ;;  %vm3688_vm12 = vcmp.eq.f32.partialorder %v659_v0, 8.507059e+37  ;;  %v662_v2 = vor.u32 1.1754944e-38, %v661_v63  ;;  %2917 = vrcp.f32 %v3681_v7 }
  0x7a   :  { %v3693_v16 = vadd.f32 1.0, %v2906_v3  ;;  %v2912_v49 = vpop.eup %2911  ;;  %vm686_vm13 = vweird.f32 %v2908_v6  ;;  %v614_v50 = vand.u32 2147483647, %v3681_v7  ;;  %2919 = vrcp.f32 %v3683_v8 }
  0x7b   :  { %v682_v17 = vsub.f32 1.0, %v681_v9  ;;  %v651_v51 = vmul.f32 %v2912_v49, %v3659_v54  ;;  %vm3698_vm14 = vcmp.eq.f32.partialorder %v629_v36, 8.507059e+37  ;;  %v632_v53 = vor.u32 1.1754944e-38, %v631_v5  ;;  %vm3708_vm6 = vmor %vm685_vm8, %vm686_vm13 }
  0x7c   :  { %v2914_v18 = vpop.eup %2913  ;;  %v616_v14 = vand.u32 2147483648, %v3681_v7  ;;  %vm610_vm15 = vweird.f32 %v3681_v7  ;;  %vm580_vm0 = vweird.f32 %v3683_v8  ;;  %vm656_vm1 = vweird.f32 %v2912_v49 }
  0x7d   :  { %v2916_v21 = vpop.eup %2915  ;;  %v683_v22 = vmul.f32 %v2908_v6, %v682_v17  ;;  %v621_v15 = vmul.f32 %v2914_v18, %v3661_v59  ;;  %v652_v24 = vsub.f32 1.0, %v651_v51  ;;  %v584_v27 = vand.u32 2147483647, %v3683_v8  ;;  %vm3725_vm3 = vmor %vm655_vm10, %vm656_vm1  ;;  %v31_v17 = vld [vmem:[%s5346_s0 + $0x80] sm:$0xff]  ;;  %v34_v51 = vld [vmem:[%s5346_s0 + $0x98] sm:$0xff] }
  0x7e   :  { %2921 = vrcp.f32 %v3693_v16  ;;  %vm626_vm2 = vweird.f32 %v2914_v18  ;;  %vm3714_vm4 = vcmp.eq.f32.partialorder %v614_v50, 8.507059e+37  ;;  %v617_v31 = vor.u32 1.1754944e-38, %v616_v14 }
  0x7f   :  { %v684_v28 = vadd.f32 %v2908_v6, %v683_v22  ;;  %v622_v26 = vsub.f32 1.0, %v621_v15  ;;  %v2918_v30 = vpop.eup %2917  ;;  %v653_v19 = vmul.f32 %v2912_v49, %v652_v24  ;;  %v586_v32 = vand.u32 2147483648, %v3683_v8  ;;  %vm3736_vm7 = vmor %vm625_vm11, %vm626_vm2  ;;  %v3808_v22 = vpop.permute.xlu2 %967 }
  0x80   :  { %v3719_v33 = vadd.f32 1.0, %v2910_v11  ;;  %v2920_v37 = vpop.eup %2919  ;;  %v606_v40 = vmul.f32 %v2918_v30, %v3681_v7  ;;  %vm550_vm5 = vweird.f32 %v3693_v16  ;;  %v554_v25 = vand.u32 2147483647, %v3693_v16 }
  0x81   :  { %v688_v38 = vsel %vm3708_vm6, %v2908_v6, %v684_v28  ;;  %v623_v39 = vmul.f32 %v2914_v18, %v622_v26  ;;  %v654_v41 = vadd.f32 %v2912_v49, %v653_v19  ;;  %v576_v45 = vmul.f32 %v2920_v37, %v3683_v8  ;;  %v32_v26 = vld [vmem:[%s5346_s0 + $0x88] sm:$0xff] }
  0x82   :  { %v693_v43 = vsel %vm3675_vm9, %v692_v10, %v688_v38  ;;  %v607_v47 = vsub.f32 1.0, %v606_v40  ;;  %vm611_vm8 = vweird.f32 %v2918_v30  ;;  %v3742_v48 = vadd.f32 1.0, %v2916_v21 }
  0x83   :  { %1052 = vperm.xlu1 %2789, %v693_v43   ;;  %v624_v46 = vadd.f32 %v2914_v18, %v623_v39  ;;  %v658_v42 = vsel %vm3725_vm3, %v2912_v49, %v654_v41  ;;  %v577_v29 = vsub.f32 1.0, %v576_v45  ;;  %vm581_vm9 = vweird.f32 %v2920_v37  ;;  %vm3759_vm10 = vmor %vm610_vm15, %vm611_vm8  ;;  %v33_v49 = vld [vmem:[%s5346_s0 + $0x90] sm:$0xff] }
  0x84   :  { %v2922_v52 = vpop.eup %2921  ;;  %2923 = vrcp.f32 %v3719_v33  ;;  %v663_v54 = vsel %vm3688_vm12, %v662_v2, %v658_v42  ;;  %v608_v56 = vmul.f32 %v2918_v30, %v607_v47  ;;  %v587_v35 = vor.u32 1.1754944e-38, %v586_v32  ;;  %vm3767_vm11 = vmor %vm580_vm0, %vm581_vm9  ;;  %v893_v45 = vld [vmem:[%s5347_s1 + $0x270] sm:$0xff] }
  0x85   :  { %v628_v55 = vsel %vm3736_vm7, %v2914_v18, %v624_v46  ;;  %v546_v57 = vmul.f32 %v2922_v52, %v3693_v16  ;;  %1042 = vperm.xlu0 %2788, %v663_v54   ;;  %v578_v62 = vmul.f32 %v2920_v37, %v577_v29  ;;  %v556_v0 = vand.u32 2147483648, %v3693_v16  ;;  %v845_v54 = vld [vmem:[%s5347_s1 + $0xf0] sm:$0xff] }
  0x86   :  { %v633_v59 = vsel %vm3698_vm14, %v632_v53, %v628_v55  ;;  %v609_v63 = vadd.f32 %v2918_v30, %v608_v56  ;;  %vm551_vm12 = vweird.f32 %v2922_v52  ;;  %2925 = vrcp.f32 %v3742_v48 }
  0x87   :  { %1032 = vperm.xlu2 %2790, %v633_v59   ;;  %v547_v1 = vsub.f32 1.0, %v546_v57  ;;  %v579_v4 = vadd.f32 %v2920_v37, %v578_v62  ;;  %vm585_vm13 = vcmp.eq.f32.partialorder %v584_v27, 8.507059e+37  ;;  %v599_v6 = vand.u32 2147483647, %v3719_v33  ;;  %vm3785_vm15 = vmor %vm550_vm5, %vm551_vm12 }
  0x88   :  { %v2415_v36 = vmul.f32 -1.442695, %v35_v58  ;;  %v613_v5 = vsel %vm3759_vm10, %v2918_v30, %v609_v63  ;;  %vm3775_vm14 = vcmp.eq.f32.partialorder %v554_v25, 8.507059e+37  ;;  %v557_v2 = vor.u32 1.1754944e-38, %v556_v0  ;;  %v891_v0 = vld [vmem:[%s5347_s1 + $0x260] sm:$0xff] }
  0x89   :  { %v548_v7 = vmul.f32 %v2922_v52, %v547_v1  ;;  %v618_v10 = vsel %vm3714_vm4, %v617_v31, %v613_v5  ;;  %v583_v11 = vsel %vm3767_vm11, %v2920_v37, %v579_v4  ;;  %2927 = vpow2.f32 %v3665_v61  ;;  %v887_v63 = vld [vmem:[%s5347_s1 + $0x240] sm:$0xff] }
  0x8a   :  { %v2924_v8 = vpop.eup %2923  ;;  %v588_v50 = vsel %vm585_vm13, %v587_v35, %v583_v11  ;;  %vm595_vm0 = vweird.f32 %v3719_v33  ;;  %vm3801_vm1 = vcmp.eq.f32.partialorder %v599_v6, 8.507059e+37  ;;  %v601_v20 = vand.u32 2147483648, %v3719_v33  ;;  %v3858_v35 = vpop.permute.xlu2 %972 }
  0x8b   :  { %1027 = vperm.xlu1 %2789, %v618_v10   ;;  %v549_v18 = vadd.f32 %v2922_v52, %v548_v7  ;;  %v591_v16 = vmul.f32 %v2924_v8, %v3719_v33  ;;  %vm596_vm6 = vweird.f32 %v2924_v8  ;;  %2929 = vpow2.f32 %v2415_v36 }
  0x8c   :  { %v2926_v53 = vpop.eup %2925  ;;  %v2413_v15 = vmul.f32 -1.442695, %v33_v49  ;;  %v2411_v23 = vmul.f32 -1.442695, %v31_v17  ;;  %vm565_vm2 = vweird.f32 %v3742_v48  ;;  %v2414_v28 = vmul.f32 -1.442695, %v34_v51  ;;  %vm3822_vm4 = vmor %vm595_vm0, %vm596_vm6 }
  0x8d   :  { %v553_v14 = vsel %vm3785_vm15, %v2922_v52, %v549_v18  ;;  %v592_v21 = vsub.f32 1.0, %v591_v16  ;;  %1017 = vperm.xlu0 %2788, %v588_v50   ;;  %v561_v27 = vmul.f32 %v2926_v53, %v3742_v48  ;;  %v569_v30 = vand.u32 2147483647, %v3742_v48 }
  0x8e   :  { %v558_v24 = vsel %vm3775_vm14, %v557_v2, %v553_v14  ;;  %v571_v19 = vand.u32 2147483648, %v3742_v48  ;;  %2931 = vpow2.f32 %v2413_v15  ;;  %v602_v37 = vor.u32 1.1754944e-38, %v601_v20  ;;  %v843_v48 = vld [vmem:[%s5347_s1 + $0xe0] sm:$0xff] }
  0x8f   :  { %1007 = vperm.xlu2 %2790, %v558_v24   ;;  %v593_v13 = vmul.f32 %v2924_v8, %v592_v21  ;;  %v2928_v31 = vpop.eup %2927  ;;  %v562_v38 = vsub.f32 1.0, %v561_v27  ;;  %vm566_vm3 = vweird.f32 %v2926_v53  ;;  %2933 = vpow2.f32 %v2411_v23 }
  0x90   :  { %v3826_v39 = vadd.f32 1.0, %v2928_v31  ;;  %2935 = vpow2.f32 %v2414_v28  ;;  %v2412_v40 = vmul.f32 -1.442695, %v32_v26  ;;  %vm3834_vm5 = vmor %vm565_vm2, %vm566_vm3  ;;  %v572_v25 = vor.u32 1.1754944e-38, %v571_v19  ;;  %v3850_v55 = vpop.permute.xlu0 %1087 }
  0x91   :  { %v594_v34 = vadd.f32 %v2924_v8, %v593_v13  ;;  %v2930_v43 = vpop.eup %2929  ;;  %v563_v41 = vmul.f32 %v2926_v53, %v562_v38  ;;  %v3828_v44 = vpop.permute.xlu1 %1077  ;;  %vm570_vm7 = vcmp.eq.f32.partialorder %v569_v30, 8.507059e+37  ;;  %v3867_v3 = vmul.f32 %v3808_v22, %v843_v48 }
  0x92   :  { %2937 = vrcp.f32 %v3826_v39  ;;  %v3841_v52 = vadd.f32 1.0, %v2930_v43  ;;  %v539_v29 = vand.u32 2147483647, %v3826_v39  ;;  %v541_v60 = vand.u32 2147483648, %v3826_v39  ;;  %v881_v43 = vld [vmem:[%s5347_s1 + $0x210] sm:$0xff] }
  0x93   :  { %v598_v33 = vsel %vm3822_vm4, %v2924_v8, %v594_v34  ;;  %v564_v47 = vadd.f32 %v2926_v53, %v563_v41  ;;  %2939 = vpow2.f32 %v2412_v40  ;;  %v3874_v6 = vmul.f32 %v3858_v35, %v845_v54 }
  0x94   :  { %v603_v46 = vsel %vm3801_vm1, %v602_v37, %v598_v33  ;;  %v2932_v42 = vpop.eup %2931  ;;  %2941 = vrcp.f32 %v3841_v52  ;;  %vm535_vm8 = vweird.f32 %v3826_v39  ;;  %vm3877_vm9 = vcmp.eq.f32.partialorder %v539_v29, 8.507059e+37 }
  0x95   :  { %1022 = vperm.xlu1 %2789, %v603_v46   ;;  %v2934_v56 = vpop.eup %2933  ;;  %v568_v57 = vsel %vm3834_vm5, %v2926_v53, %v564_v47  ;;  %v3856_v62 = vadd.f32 1.0, %v2932_v42  ;;  %v524_v7 = vand.u32 2147483647, %v3841_v52  ;;  %v526_v8 = vand.u32 2147483648, %v3841_v52 }
  0x96   :  { %v2936_v58 = vpop.eup %2935  ;;  %v573_v59 = vsel %vm570_vm7, %v572_v25, %v568_v57  ;;  %v3869_v1 = vadd.f32 1.0, %v2934_v56  ;;  %v3886_v10 = vmul.f32 %v3850_v55, %v891_v0  ;;  %v3889_v11 = vmul.f32 %v3828_v44, %v887_v63  ;;  %v840_v0 = vld [vmem:[%s5347_s1 + $0xc8] sm:$0xff] }
  0x97   :  { %1012 = vperm.xlu0 %2788, %v573_v59   ;;  %v3871_v4 = vadd.f32 1.0, %v2936_v58  ;;  %2943 = vrcp.f32 %v3856_v62  ;;  %v542_v2 = vor.u32 1.1754944e-38, %v541_v60  ;;  %v494_v49 = vand.u32 2147483647, %v3856_v62 }
  0x98   :  { %v2938_v36 = vpop.eup %2937  ;;  %2945 = vrcp.f32 %v3869_v1  ;;  %v496_v18 = vand.u32 2147483648, %v3856_v62  ;;  %v464_v16 = vand.u32 2147483647, %v3869_v1  ;;  %vm520_vm11 = vweird.f32 %v3841_v52  ;;  %v3920_v26 = vpop.permute.xlu0 %1092 }
  0x99   :  { %v531_v9 = vmul.f32 %v2938_v36, %v3826_v39  ;;  %v2940_v12 = vpop.eup %2939  ;;  %vm536_vm10 = vweird.f32 %v2938_v36  ;;  %2947 = vrcp.f32 %v3871_v4  ;;  %v3896_v51 = vpop.permute.xlu1 %1082  ;;  %vm3900_vm12 = vcmp.eq.f32.partialorder %v524_v7, 8.507059e+37 }
  0x9a   :  { %v2942_v17 = vpop.eup %2941  ;;  %v466_v53 = vand.u32 2147483648, %v3869_v1  ;;  %v527_v21 = vor.u32 1.1754944e-38, %v526_v8  ;;  %vm490_vm13 = vweird.f32 %v3856_v62  ;;  %vm460_vm14 = vweird.f32 %v3869_v1  ;;  %vm3910_vm15 = vmor %vm535_vm8, %vm536_vm10 }
  0x9b   :  { %v532_v50 = vsub.f32 1.0, %v531_v9  ;;  %v516_v61 = vmul.f32 %v2942_v17, %v3841_v52  ;;  %vm521_vm0 = vweird.f32 %v2942_v17  ;;  %vm3914_vm6 = vcmp.eq.f32.partialorder %v494_v49, 8.507059e+37 }
  0x9c   :  { %v3918_v28 = vadd.f32 1.0, %v2940_v12  ;;  %v497_v19 = vor.u32 1.1754944e-38, %v496_v18  ;;  %vm3923_vm1 = vcmp.eq.f32.partialorder %v464_v16, 8.507059e+37  ;;  %v467_v38 = vor.u32 1.1754944e-38, %v466_v53  ;;  %vm3934_vm2 = vmor %vm520_vm11, %vm521_vm0  ;;  %v3976_v12 = vpop.permute.xlu2 %957  ;;  %v888_v16 = vld [vmem:[%s5347_s1 + $0x248] sm:$0xff] }
  0x9d   :  { %v533_v14 = vmul.f32 %v2938_v36, %v532_v50  ;;  %v2944_v15 = vpop.eup %2943  ;;  %v517_v24 = vsub.f32 1.0, %v516_v61  ;;  %v509_v34 = vand.u32 2147483647, %v3871_v4  ;;  %v511_v52 = vand.u32 2147483648, %v3871_v4  ;;  %v885_v61 = vld [vmem:[%s5347_s1 + $0x230] sm:$0xff] }
  0x9e   :  { %v486_v30 = vmul.f32 %v2944_v15, %v3856_v62  ;;  %v2946_v32 = vpop.eup %2945  ;;  %2949 = vrcp.f32 %v3918_v28  ;;  %vm491_vm4 = vweird.f32 %v2944_v15  ;;  %vm505_vm5 = vweird.f32 %v3871_v4  ;;  %v889_v62 = vld [vmem:[%s5347_s1 + $0x250] sm:$0xff] }
  0x9f   :  { %v534_v13 = vadd.f32 %v2938_v36, %v533_v14  ;;  %v518_v37 = vmul.f32 %v2942_v17, %v517_v24  ;;  %v2948_v39 = vpop.eup %2947  ;;  %v456_v33 = vmul.f32 %v2946_v32, %v3869_v1  ;;  %vm461_vm3 = vweird.f32 %v2946_v32  ;;  %vm3951_vm7 = vmor %vm490_vm13, %vm491_vm4  ;;  %v883_v14 = vld [vmem:[%s5347_s1 + $0x220] sm:$0xff] }
  0xa0   :  { %v487_v41 = vsub.f32 1.0, %v486_v30  ;;  %v501_v47 = vmul.f32 %v2948_v39, %v3871_v4  ;;  %vm506_vm8 = vweird.f32 %v2948_v39  ;;  %v1173_v57 = vmul.f32 %v3920_v26, %v893_v45  ;;  %vm3970_vm10 = vmor %vm460_vm14, %vm461_vm3 }
  0xa1   :  { %v538_v40 = vsel %vm3910_vm15, %v2938_v36, %v534_v13  ;;  %v519_v46 = vadd.f32 %v2942_v17, %v518_v37  ;;  %v457_v29 = vsub.f32 1.0, %v456_v33  ;;  %v512_v9 = vor.u32 1.1754944e-38, %v511_v52 }
  0xa2   :  { %v543_v25 = vsel %vm3877_vm9, %v542_v2, %v538_v40  ;;  %v488_v42 = vmul.f32 %v2944_v15, %v487_v41  ;;  %v502_v56 = vsub.f32 1.0, %v501_v47  ;;  %vm3958_vm9 = vcmp.eq.f32.partialorder %v509_v34, 8.507059e+37  ;;  %v3965_v63 = vpop.permute.xlu1 %1072  ;;  %v890_v2 = vld [vmem:[%s5347_s1 + $0x258] sm:$0xff]  ;;  %v879_v40 = vld [vmem:[%s5347_s1 + $0x200] sm:$0xff] }
  0xa3   :  { %1002 = vperm.xlu2 %2790, %v543_v25   ;;  %v523_v48 = vsel %vm3934_vm2, %v2942_v17, %v519_v46  ;;  %v458_v60 = vmul.f32 %v2946_v32, %v457_v29  ;;  %vm475_vm11 = vweird.f32 %v3918_v28  ;;  %v479_v8 = vand.u32 2147483647, %v3918_v28  ;;  %v846_v46 = vld [vmem:[%s5347_s1 + $0xf8] sm:$0xff]  ;;  %v839_v47 = vld [vmem:[%s5347_s1 + $0xc0] sm:$0xff] }
  0xa4   :  { %v528_v58 = vsel %vm3900_vm12, %v527_v21, %v523_v48  ;;  %v489_v59 = vadd.f32 %v2944_v15, %v488_v42  ;;  %v2950_v36 = vpop.eup %2949  ;;  %v503_v7 = vmul.f32 %v2948_v39, %v502_v56  ;;  %vm3986_vm12 = vmor %vm505_vm5, %vm506_vm8  ;;  %v481_v18 = vand.u32 2147483648, %v3918_v28  ;;  %v4004_v21 = vpop.permute.xlu0 %1067  ;;  %v841_v42 = vld [vmem:[%s5347_s1 + $0xd0] sm:$0xff] }
  0xa5   :  { %997 = vperm.xlu1 %2789, %v528_v58   ;;  %v459_v1 = vadd.f32 %v2946_v32, %v458_v60  ;;  %v471_v50 = vmul.f32 %v2950_v36, %v3918_v28  ;;  %vm476_vm13 = vweird.f32 %v2950_v36  ;;  %v1169_v53 = vmul.f32 %v3896_v51, %v889_v62  ;;  %v4048_v45 = vpop.permute.xlu2 %1062 }
  0xa6   :  { %v493_v49 = vsel %vm3951_vm7, %v2944_v15, %v489_v59  ;;  %v504_v4 = vadd.f32 %v2948_v39, %v503_v7  ;;  %v4009_v24 = vmul.f32 %v3896_v51, %v890_v2  ;;  %v1293_v27 = vpack.c.bf16 %v1173_v57, %v3886_v10  ;;  %vm4026_vm14 = vmor %vm475_vm11, %vm476_vm13  ;;  %v842_v59 = vld [vmem:[%s5347_s1 + $0xd8] sm:$0xff]  ;;  %v835_v7 = vld [vmem:[%s5347_s1 + $0xa0] sm:$0xff] }
  0xa7   :  { %v498_v20 = vsel %vm3914_vm6, %v497_v19, %v493_v49  ;;  %v463_v15 = vsel %vm3970_vm10, %v2946_v32, %v459_v1  ;;  %v472_v23 = vsub.f32 1.0, %v471_v50  ;;  %v4017_v19 = vmul.f32 %v3828_v44, %v888_v16 }
  0xa8   :  { %987 = vperm.xlu0 %2788, %v498_v20   ;;  %v468_v13 = vsel %vm3923_vm1, %v467_v38, %v463_v15  ;;  %v508_v30 = vsel %vm3986_vm12, %v2948_v39, %v504_v4  ;;  %v1165_v37 = vmul.f32 %v3965_v63, %v885_v61  ;;  %1878 = vmatpush.bf16.msra.mxu2 %v1293_v27  ;;  %v482_v31 = vor.u32 1.1754944e-38, %v481_v18  ;;  %v831_v20 = vld [vmem:[%s5347_s1 + $0x80] sm:$0xff] }
  0xa9   :  { %v513_v32 = vsel %vm3958_vm9, %v512_v9, %v508_v30  ;;  %v473_v34 = vmul.f32 %v2950_v36, %v472_v23  ;;  %v1163_v51 = vmul.f32 %v4004_v21, %v883_v14  ;;  %2783 = vmatpush.bf16.msra.mxu3 %v1293_v27  ;;  %v1269_v44 = vpack.c.bf16 %v3874_v6, %v3867_v3  ;;  %v836_v9 = vld [vmem:[%s5347_s1 + $0xa8] sm:$0xff]  ;;  %v834_v14 = vld [vmem:[%s5347_s1 + $0x98] sm:$0xff] }
  0xaa   :  { %vm480_vm15 = vcmp.eq.f32.partialorder %v479_v8, 8.507059e+37  ;;  %v1291_v39 = vpack.c.bf16 %v1169_v53, %v3889_v11  ;;  %v1292_v28 = vpack.c.bf16 %v4009_v24, %v4017_v19  ;;  %v844_v11 = vld [vmem:[%s5347_s1 + $0xe8] sm:$0xff]  ;;  %v1161_v52 = vmul.f32 %v4048_v45, %v881_v43  ;;  %v833_v53 = vld [vmem:[%s5347_s1 + $0x90] sm:$0xff] }
  0xab   :  { %977 = vperm.xlu2 %2790, %v468_v13   ;;  %v474_v38 = vadd.f32 %v2950_v36, %v473_v34  ;;  %1656 = vmatpush.bf16.msra.mxu0 %v1269_v44  ;;  %v1289_v6 = vpack.c.bf16 %v1165_v37, %v1163_v51  ;;  %v1124_v54 = vmul.f32 %v3808_v22, %v844_v11  ;;  %v837_v22 = vld [vmem:[%s5347_s1 + $0xb0] sm:$0xff]  ;;  %v2445_v27 = vld [vmem:[%s5348_s2 + $0x8] sm:$0xf]  ;;  %vm1595_vm0 = vcmask 523264  }
  0xac   :  { %1879 = vmatpush.bf16.msra.mxu2 %v1291_v39  ;;  %2775 = vmatpush.bf16.msra.mxu1 %v1269_v44  ;;  %v1126_v56 = vmul.f32 %v3858_v35, %v846_v46  ;;  %v1119_v57 = vmul.f32 %v3976_v12, %v839_v47  ;;  %v838_v35 = vld [vmem:[%s5347_s1 + $0xb8] sm:$0xff]  ;;  %v1120_v8 = vmul.f32 %v3976_v12, %v840_v0  ;;  %v832_v12 = vld [vmem:[%s5347_s1 + $0x88] sm:$0xff]  ;;  %v2717_v13 = vld [vmem:[%s5348_s2 + $0x10] sm:$0xf0]  ;;  %vm2311_vm6 = vcmask 556032  }
  0xad   :  { %992 = vperm.xlu1 %2789, %v513_v32   ;;  %v478_v3 = vsel %vm4026_vm14, %v2950_v36, %v474_v38  ;;  %2784 = vmatpush.bf16.msra.mxu3 %v1291_v39  ;;  %v938_v4 = vpop.permute.xlu2 %937  ;;  %v4101_v34 = vor.u32 %v2717_v13, %v2445_v27  ;;  %v829_v44 = vld [vmem:[%s5347_s1 + $0x70] sm:$0xff]  ;;  %v827_v38 = vld [vmem:[%s5347_s1 + $0x60] sm:$0xff]  ;;  %v828_v39 = vld [vmem:[%s5347_s1 + $0x68] sm:$0xff] }
  0xae   :  { %v483_v33 = vsel %vm480_vm15, %v482_v31, %v478_v3  ;;  %v1270_v5 = vpack.c.bf16 %v1126_v56, %v1124_v54  ;;  %v1111_v15 = vmul.f32 %v938_v4, %v831_v20  ;;  %v1112_v30 = vmul.f32 %v938_v4, %v832_v12  ;;  %v824_v47 = vld [vmem:[%s5347_s1 + $0x48] sm:$0xff]  ;;  %v815_v4 = vld [vmem:[%s5347_s1] sm:$0xff]  ;;  %v2557_v13 = vld [vmem:[%s5348_s2 + $0xf0] sm:$0xf] }
  0xaf   :  { %v816_v12 = vld [vmem:[%s5347_s1 + $0x8] sm:$0xff]  ;;  %v877_v19 = vld [vmem:[%s5347_s1 + $0x1f0] sm:$0xff] }
  0xb0   :  { %v4043_v41 = vpop.permute.xlu1 %1057  ;;  %982 = vperm.xlu0 %2788, %v483_v33   ;;  %1880 = vmatpush.bf16.msra.mxu2 %v1289_v6  ;;  %v876_v24 = vld [vmem:[%s5347_s1 + $0x1e8] sm:$0xff] }
  0xb1   :  { %v1159_v25 = vmul.f32 %v4043_v41, %v879_v40  ;;  %2785 = vmatpush.bf16.msra.mxu3 %v1289_v6  ;;  %v830_v40 = vld [vmem:[%s5347_s1 + $0x78] sm:$0xff] }
  0xb3   :  { %v1287_v48 = vpack.c.bf16 %v1161_v52, %v1159_v25  ;;  %v823_v25 = vld [vmem:[%s5347_s1 + $0x40] sm:$0xff] }
  0xb4   :  { %v963_v29 = vpop.permute.xlu0 %962 }
  0xb5   :  { %v1121_v58 = vmul.f32 %v963_v29, %v841_v42  ;;  %1881 = vmatpush.bf16.msra.mxu2 %v1287_v48  ;;  %v1122_v36 = vmul.f32 %v963_v29, %v842_v59  ;;  %2786 = vmatpush.bf16.msra.mxu3 %v1287_v48  ;;  %v933_v31 = vpop.permute.xlu2 %932  ;;  %v2457_v42 = vld [vmem:[%s5348_s2 + $0x20] sm:$0xf]  ;;  %v2720_v29 = vld [vmem:[%s5348_s2 + $0x28] sm:$0xf0] }
  0xb6   :  { %v1109_v3 = vmul.f32 %v933_v31, %v829_v44  ;;  %v1110_v33 = vmul.f32 %v933_v31, %v830_v40  ;;  %v4129_v54 = vor.u32 %v2720_v29, %v2457_v42  ;;  %v2716_v31 = vld [vmem:[%s5348_s2 + $0x8] sm:$0xf0] }
  0xb7   :  { %v1267_v60 = vpack.c.bf16 %v1121_v58, %v1119_v57  ;;  %v1268_v18 = vpack.c.bf16 %v1122_v36, %v1120_v8  ;;  %v825_v57 = vld [vmem:[%s5347_s1 + $0x50] sm:$0xff]  ;;  %v826_v58 = vld [vmem:[%s5347_s1 + $0x58] sm:$0xff]  ;;  %v820_v36 = vld [vmem:[%s5347_s1 + $0x28] sm:$0xff] }
  0xb8   :  { %v953_v62 = vpop.permute.xlu1 %952  ;;  %2675 = vmatmul.msk.bf16.vlgmr.msra.gmra.mxu2 %vm1595_vm0, %v4101_v34  ;;  %v822_v8 = vld [vmem:[%s5347_s1 + $0x38] sm:$0xff] }
  0xb9   :  { %1657 = vmatpush.bf16.msra.mxu0 %v1267_v60  ;;  %2776 = vmatpush.bf16.msra.mxu1 %v1267_v60  ;;  %v1117_v2 = vmul.f32 %v953_v62, %v837_v22  ;;  %v1118_v49 = vmul.f32 %v953_v62, %v838_v35  ;;  %v819_v62 = vld [vmem:[%s5347_s1 + $0x20] sm:$0xff] }
  0xba   :  { %1983 = vmatpush.bf16.msrb.mxu3 %v1270_v5 }
  0xbc   :  { %v948_v1 = vpop.permute.xlu0 %947 }
  0xbd   :  { %v1115_v17 = vmul.f32 %v948_v1, %v835_v7  ;;  %v1116_v50 = vmul.f32 %v948_v1, %v836_v9  ;;  %v821_v9 = vld [vmem:[%s5347_s1 + $0x30] sm:$0xff] }
  0xbe   :  { %1984 = vmatpush.bf16.msrb.mxu3 %v1268_v18  ;;  %v908_v56 = vpop.permute.xlu2 %907 }
  0xbf   :  { %v1265_v16 = vpack.c.bf16 %v1117_v2, %v1115_v17  ;;  %v1266_v61 = vpack.c.bf16 %v1118_v49, %v1116_v50  ;;  %v894_v49 = vld [vmem:[%s5347_s1 + $0x278] sm:$0xff]  ;;  %v1099_v1 = vmul.f32 %v908_v56, %v819_v62  ;;  %v1100_v17 = vmul.f32 %v908_v56, %v820_v36 }
  0xc0   :  { %v882_v56 = vld [vmem:[%s5347_s1 + $0x218] sm:$0xff] }
  0xc1   :  { %1658 = vmatpush.bf16.msra.mxu0 %v1265_v16  ;;  %2777 = vmatpush.bf16.msra.mxu1 %v1265_v16  ;;  %v892_v16 = vld [vmem:[%s5347_s1 + $0x268] sm:$0xff] }
  0xc2   :  { %1985 = vmatpush.bf16.msrb.mxu3 %v1266_v61  ;;  %v817_v61 = vld [vmem:[%s5347_s1 + $0x10] sm:$0xff] }
  0xc4   :  { %v943_v23 = vpop.permute.xlu0 %942 }
  0xc5   :  { %v1113_v37 = vmul.f32 %v943_v23, %v833_v53  ;;  %v1114_v32 = vmul.f32 %v943_v23, %v834_v14  ;;  %v818_v23 = vld [vmem:[%s5347_s1 + $0x18] sm:$0xff] }
  0xc6   :  { %v903_v20 = vpop.permute.xlu2 %902 }
  0xc7   :  { %v1263_v51 = vpack.c.bf16 %v1113_v37, %v1111_v15  ;;  %v1264_v10 = vpack.c.bf16 %v1114_v32, %v1112_v30  ;;  %v1174_v15 = vmul.f32 %v3920_v26, %v894_v49  ;;  %v1172_v30 = vmul.f32 %v3850_v55, %v892_v16  ;;  %v2746_v26 = vld [vmem:[%s5348_s2 + $0xf8] sm:$0xf0]  ;;  %v2469_v55 = vld [vmem:[%s5348_s2 + $0x38] sm:$0xf]  ;;  %v873_v16 = vld [vmem:[%s5347_s1 + $0x1d0] sm:$0xff] }
  0xc8   :  { %2676 = vmatmul.msk.bf16.gmra.mxu2 %vm1595_vm0, %v4129_v54  ;;  %v1097_v37 = vmul.f32 %v903_v20, %v817_v61  ;;  %v1098_v44 = vmul.f32 %v903_v20, %v818_v23  ;;  %v874_v61 = vld [vmem:[%s5347_s1 + $0x1d8] sm:$0xff] }
  0xc9   :  { %1659 = vmatpush.bf16.msra.mxu0 %v1263_v51  ;;  %2778 = vmatpush.bf16.msra.mxu1 %v1263_v51 }
  0xca   :  { %1986 = vmatpush.bf16.msrb.mxu3 %v1264_v10  ;;  %v2437_v10 = vld [vmem:[%s5348_s2] sm:$0xf] }
  0xd1   :  { %v928_v43 = vpop.permute.xlu1 %927 }
  0xd2   :  { %v1107_v6 = vmul.f32 %v928_v43, %v827_v38  ;;  %v1108_v11 = vmul.f32 %v928_v43, %v828_v39  ;;  %v2723_v38 = vld [vmem:[%s5348_s2 + $0x40] sm:$0xf0]  ;;  %v2577_v39 = vld [vmem:[%s5348_s2 + $0x110] sm:$0xf]  ;;  %v1294_v43 = vpack.c.bf16 %v1174_v15, %v1172_v30 }
  0xd4   :  { %v1261_v46 = vpack.c.bf16 %v1109_v3, %v1107_v6  ;;  %v1262_v52 = vpack.c.bf16 %v1110_v33, %v1108_v11  ;;  %v4192_v3 = vor.u32 %v2723_v38, %v2469_v55  ;;  %v2750_v6 = vld [vmem:[%s5348_s2 + $0x118] sm:$0xf0]  ;;  %v4197_v33 = vor.u32 %v2746_v26, %v2557_v13  ;;  %v867_v26 = vld [vmem:[%s5347_s1 + $0x1a0] sm:$0xff] }
  0xd5   :  { %v918_v48 = vpop.permute.xlu0 %917 }
  0xd6   :  { %1660 = vmatpush.bf16.msra.mxu0 %v1261_v46  ;;  %2779 = vmatpush.bf16.msra.mxu1 %v1261_v46  ;;  %v1103_v59 = vmul.f32 %v918_v48, %v823_v25  ;;  %v1104_v60 = vmul.f32 %v918_v48, %v824_v47  ;;  %v4199_v25 = vor.u32 %v2716_v31, %v2437_v10  ;;  %v886_v47 = vld [vmem:[%s5347_s1 + $0x238] sm:$0xff]  ;;  %v880_v48 = vld [vmem:[%s5347_s1 + $0x208] sm:$0xff] }
  0xd7   :  { %1987 = vmatpush.bf16.msrb.mxu3 %v1262_v52  ;;  %v4201_v46 = vor.u32 %v2750_v6, %v2577_v39  ;;  %v884_v52 = vld [vmem:[%s5347_s1 + $0x228] sm:$0xff]  ;;  %v1166_v42 = vmul.f32 %v3965_v63, %v886_v47  ;;  %v1160_v63 = vmul.f32 %v4043_v41, %v880_v48 }
  0xd8   :  { %2677 = vmatmul.msk.bf16.gmra.mxu2 %vm1595_vm0, %v4192_v3  ;;  %v1164_v29 = vmul.f32 %v4004_v21, %v884_v52  ;;  %v868_v10 = vld [vmem:[%s5347_s1 + $0x1a8] sm:$0xff]  ;;  %v863_v52 = vld [vmem:[%s5347_s1 + $0x180] sm:$0xff] }
  0xd9   :  { %v923_v0 = vpop.permute.xlu1 %922  ;;  %2686 = vmatmul.msk.bf16.vlgmr.msra.gmra.mxu3 %vm1595_vm0, %v4201_v46  ;;  %v2752_v48 = vld [vmem:[%s5348_s2 + $0x128] sm:$0xf0] }
  0xda   :  { %v1105_v22 = vmul.f32 %v923_v0, %v825_v57  ;;  %v1106_v35 = vmul.f32 %v923_v0, %v826_v58  ;;  %v1290_v21 = vpack.c.bf16 %v1166_v42, %v1164_v29  ;;  %v1162_v58 = vmul.f32 %v4048_v45, %v882_v56  ;;  %v2569_v45 = vld [vmem:[%s5348_s2 + $0x108] sm:$0xf]  ;;  %v2749_v0 = vld [vmem:[%s5348_s2 + $0x110] sm:$0xf0]  ;;  %v2581_v29 = vld [vmem:[%s5348_s2 + $0x120] sm:$0xf] }
  0xdb   :  { %v864_v42 = vld [vmem:[%s5347_s1 + $0x188] sm:$0xff]  ;;  %v2461_v56 = vld [vmem:[%s5348_s2 + $0x30] sm:$0xf] }
  0xdc   :  { %v1259_v5 = vpack.c.bf16 %v1105_v22, %v1103_v59  ;;  %v1260_v7 = vpack.c.bf16 %v1106_v35, %v1104_v60  ;;  %v1038_v59 = vpop.permute.xlu2 %1037  ;;  %v875_v60 = vld [vmem:[%s5347_s1 + $0x1e0] sm:$0xff]  ;;  %v1288_v41 = vpack.c.bf16 %v1162_v58, %v1160_v63  ;;  %v2449_v22 = vld [vmem:[%s5348_s2 + $0x18] sm:$0xf]  ;;  %v2722_v63 = vld [vmem:[%s5348_s2 + $0x38] sm:$0xf0] }
  0xdd   :  { %v913_v2 = vpop.permute.xlu0 %912  ;;  %v2719_v35 = vld [vmem:[%s5348_s2 + $0x20] sm:$0xf0]  ;;  %v2601_v58 = vld [vmem:[%s5348_s2 + $0x140] sm:$0xf] }
  0xde   :  { %1661 = vmatpush.bf16.msra.mxu0 %v1259_v5  ;;  %2780 = vmatpush.bf16.msra.mxu1 %v1259_v5  ;;  %v1101_v50 = vmul.f32 %v913_v2, %v821_v9  ;;  %v1102_v18 = vmul.f32 %v913_v2, %v822_v8  ;;  %v2481_v5 = vld [vmem:[%s5348_s2 + $0x50] sm:$0xf]  ;;  %v2589_v9 = vld [vmem:[%s5348_s2 + $0x128] sm:$0xf]  ;;  %v871_v8 = vld [vmem:[%s5347_s1 + $0x1c0] sm:$0xff] }
  0xdf   :  { %1988 = vmatpush.bf16.msrb.mxu3 %v1260_v7  ;;  %v2726_v7 = vld [vmem:[%s5348_s2 + $0x58] sm:$0xf0] }
  0xe0   :  { %v1257_v53 = vpack.c.bf16 %v1101_v50, %v1099_v1  ;;  %v1258_v14 = vpack.c.bf16 %v1102_v18, %v1100_v17  ;;  %v4264_v49 = vor.u32 %v2726_v7, %v2481_v5  ;;  %v2753_v1 = vld [vmem:[%s5348_s2 + $0x130] sm:$0xf0]  ;;  %v872_v17 = vld [vmem:[%s5347_s1 + $0x1c8] sm:$0xff] }
  0xe1   :  { %v4278_v20 = vor.u32 %v2753_v1, %v2589_v9  ;;  %v860_v5 = vld [vmem:[%s5347_s1 + $0x168] sm:$0xff] }
  0xe2   :  { %v898_v27 = vpop.permute.xlu1 %897  ;;  %1662 = vmatpush.bf16.msra.mxu0 %v1257_v53  ;;  %2781 = vmatpush.bf16.msra.mxu1 %v1257_v53  ;;  %v1151_v53 = vmul.f32 %v1038_v59, %v871_v8  ;;  %v861_v8 = vld [vmem:[%s5347_s1 + $0x170] sm:$0xff] }
  0xe3   :  { %v1095_v32 = vmul.f32 %v898_v27, %v815_v4  ;;  %v1096_v51 = vmul.f32 %v898_v27, %v816_v12  ;;  %1989 = vmatpush.bf16.msrb.mxu3 %v1258_v14  ;;  %v4280_v4 = vor.u32 %v2749_v0, %v2569_v45  ;;  %v4282_v12 = vor.u32 %v2719_v35, %v2449_v22  ;;  %v859_v0 = vld [vmem:[%s5347_s1 + $0x160] sm:$0xff] }
  0xe4   :  { %v1152_v27 = vmul.f32 %v1038_v59, %v872_v17  ;;  %v865_v59 = vld [vmem:[%s5347_s1 + $0x190] sm:$0xff] }
  0xe5   :  { %v1255_v40 = vpack.c.bf16 %v1097_v37, %v1095_v32  ;;  %v1256_v11 = vpack.c.bf16 %v1098_v44, %v1096_v51  ;;  %v869_v37 = vld [vmem:[%s5347_s1 + $0x1b0] sm:$0xff]  ;;  %v1033_v32 = vpop.permute.xlu2 %1032  ;;  %v870_v51 = vld [vmem:[%s5347_s1 + $0x1b8] sm:$0xff] }
  0xe6   :  { %v1149_v55 = vmul.f32 %v1033_v32, %v869_v37  ;;  %v1150_v39 = vmul.f32 %v1033_v32, %v870_v51  ;;  %v2593_v37 = vld [vmem:[%s5348_s2 + $0x138] sm:$0xf]  ;;  %v2755_v32 = vld [vmem:[%s5348_s2 + $0x140] sm:$0xf0]  ;;  %v2473_v51 = vld [vmem:[%s5348_s2 + $0x48] sm:$0xf] }
  0xe7   :  { %1663 = vmatpush.bf16.msra.mxu0 %v1255_v40  ;;  %2782 = vmatpush.bf16.msra.mxu1 %v1255_v40  ;;  %v1048_v57 = vpop.permute.xlu0 %1047 }
  0xe8   :  { %1990 = vmatpush.bf16.msrb.mxu3 %v1256_v11  ;;  %v1155_v62 = vmul.f32 %v1048_v57, %v875_v60  ;;  %v1156_v36 = vmul.f32 %v1048_v57, %v876_v24  ;;  %2678 = vmatmul.msk.bf16.gmra.mxu2 %vm1595_vm0, %v4264_v49  ;;  %v2493_v57 = vld [vmem:[%s5348_s2 + $0x68] sm:$0xf]  ;;  %v866_v60 = vld [vmem:[%s5347_s1 + $0x198] sm:$0xff] }
  0xe9   :  { %2687 = vmatmul.msk.bf16.gmra.mxu3 %vm1595_vm0, %v4278_v20 }
  0xea   :  { %1714 = vmatmul.bf16.vlgmr.msra.gmra.mxu1 %v4197_v33  ;;  %1664 = vmatmul.bf16.vlgmr.msra.gmra.mxu0 %v4199_v25 }
  0xeb   :  { %2205 = vmatpush.bf16.msrb.mxu0 %v1294_v43 }
  0xed   :  { %v1008_v22 = vpop.permute.xlu2 %1007 }
  0xee   :  { %v1139_v1 = vmul.f32 %v1008_v22, %v859_v0 }
  0xef   :  { %2206 = vmatpush.bf16.msrb.mxu0 %v1292_v28  ;;  %v878_v28 = vld [vmem:[%s5347_s1 + $0x1f8] sm:$0xff] }
  0xf3   :  { %2207 = vmatpush.bf16.msrb.mxu0 %v1290_v21  ;;  %v2729_v21 = vld [vmem:[%s5348_s2 + $0x70] sm:$0xf0] }
  0xf4   :  { %v4335_v24 = vor.u32 %v2729_v21, %v2493_v57  ;;  %v851_v57 = vld [vmem:[%s5347_s1 + $0x120] sm:$0xff]  ;;  %v852_v21 = vld [vmem:[%s5347_s1 + $0x128] sm:$0xff] }
  0xf5   :  { %v1053_v2 = vpop.permute.xlu1 %1052 }
  0xf6   :  { %v1157_v50 = vmul.f32 %v1053_v2, %v877_v19  ;;  %v1158_v18 = vmul.f32 %v1053_v2, %v878_v28  ;;  %v2756_v19 = vld [vmem:[%s5348_s2 + $0x148] sm:$0xf0]  ;;  %v862_v2 = vld [vmem:[%s5347_s1 + $0x178] sm:$0xff] }
  0xf7   :  { %2208 = vmatpush.bf16.msrb.mxu0 %v1288_v41  ;;  %v1043_v23 = vpop.permute.xlu0 %1042  ;;  %v4340_v45 = vor.u32 %v2756_v19, %v2601_v58  ;;  %v853_v58 = vld [vmem:[%s5347_s1 + $0x130] sm:$0xff]  ;;  %v848_v19 = vld [vmem:[%s5347_s1 + $0x108] sm:$0xff] }
  0xf8   :  { %v1285_v14 = vpack.c.bf16 %v1157_v50, %v1155_v62  ;;  %v1286_v15 = vpack.c.bf16 %v1158_v18, %v1156_v36  ;;  %v1153_v13 = vmul.f32 %v1043_v23, %v873_v16  ;;  %v1154_v30 = vmul.f32 %v1043_v23, %v874_v61  ;;  %2679 = vmatmul.msk.bf16.gmra.mxu2 %vm1595_vm0, %v4335_v24  ;;  %v2505_v23 = vld [vmem:[%s5348_s2 + $0x80] sm:$0xf] }
  0xf9   :  { %v4345_v62 = vor.u32 %v2752_v48, %v2581_v29  ;;  %v4347_v36 = vor.u32 %v2722_v63, %v2461_v56  ;;  %2688 = vmatmul.msk.bf16.gmra.mxu3 %vm1595_vm0, %v4340_v45  ;;  %v1140_v16 = vmul.f32 %v1008_v22, %v860_v5  ;;  %v850_v5 = vld [vmem:[%s5347_s1 + $0x118] sm:$0xff] }
  0xfa   :  { %1765 = vmatpush.bf16.msrb.mxu1 %v1285_v14  ;;  %2092 = vmatpush.bf16.msrb.mxu2 %v1286_v15  ;;  %v1283_v31 = vpack.c.bf16 %v1153_v13, %v1151_v53  ;;  %v1284_v44 = vpack.c.bf16 %v1154_v30, %v1152_v27  ;;  %v2732_v27 = vld [vmem:[%s5348_s2 + $0x88] sm:$0xf0]  ;;  %v2613_v13 = vld [vmem:[%s5348_s2 + $0x158] sm:$0xf]  ;;  %v2759_v30 = vld [vmem:[%s5348_s2 + $0x160] sm:$0xf0] }
  0xfb   :  { %1719 = vmatmul.bf16.gmra.mxu1 %v4280_v4  ;;  %1669 = vmatmul.bf16.gmra.mxu0 %v4282_v12 }
  0xfd   :  { %v1028_v38 = vpop.permute.xlu1 %1027 }
  0xfe   :  { %v1147_v40 = vmul.f32 %v1028_v38, %v867_v26  ;;  %v1148_v43 = vmul.f32 %v1028_v38, %v868_v10  ;;  %1766 = vmatpush.bf16.msrb.mxu1 %v1283_v31  ;;  %2093 = vmatpush.bf16.msrb.mxu2 %v1284_v44  ;;  %v2725_v26 = vld [vmem:[%s5348_s2 + $0x50] sm:$0xf0]  ;;  %v4388_v10 = vor.u32 %v2732_v27, %v2505_v23  ;;  %v1003_v38 = vpop.permute.xlu2 %1002  ;;  %v2485_v23 = vld [vmem:[%s5348_s2 + $0x60] sm:$0xf]  ;;  %v2728_v27 = vld [vmem:[%s5348_s2 + $0x68] sm:$0xf0] }
  0xff   :  { %v1018_v6 = vpop.permute.xlu0 %1017  ;;  %v4390_v31 = vor.u32 %v2759_v30, %v2613_v13  ;;  %v857_v44 = vld [vmem:[%s5347_s1 + $0x150] sm:$0xff] }
 0x100   :  { %v1281_v11 = vpack.c.bf16 %v1149_v55, %v1147_v40  ;;  %v1282_v47 = vpack.c.bf16 %v1150_v39, %v1148_v43  ;;  %v1143_v28 = vmul.f32 %v1018_v6, %v863_v52  ;;  %v1144_v41 = vmul.f32 %v1018_v6, %v864_v42  ;;  %v858_v55 = vld [vmem:[%s5347_s1 + $0x158] sm:$0xff]  ;;  %v855_v39 = vld [vmem:[%s5347_s1 + $0x140] sm:$0xff]  ;;  %v856_v40 = vld [vmem:[%s5347_s1 + $0x148] sm:$0xff] }
 0x101   :  { %v4404_v43 = vor.u32 %v2755_v32, %v2593_v37  ;;  %v4406_v6 = vor.u32 %v2725_v26, %v2473_v51  ;;  %v1138_v52 = vmul.f32 %v1003_v38, %v858_v55  ;;  %v4468_v55 = vor.u32 %v2728_v27, %v2485_v23 }
 0x102   :  { %1767 = vmatpush.bf16.msrb.mxu1 %v1281_v11  ;;  %2094 = vmatpush.bf16.msrb.mxu2 %v1282_v47  ;;  %v1137_v47 = vmul.f32 %v1003_v38, %v857_v44  ;;  %v2529_v38 = vld [vmem:[%s5348_s2 + $0xb0] sm:$0xf] }
 0x106   :  { %v978_v0 = vpop.permute.xlu2 %977 }
 0x107   :  { %v1023_v35 = vpop.permute.xlu1 %1022 }
 0x108   :  { %v1145_v7 = vmul.f32 %v1023_v35, %v865_v59  ;;  %v1146_v9 = vmul.f32 %v1023_v35, %v866_v60  ;;  %2680 = vmatmul.msk.bf16.gmra.mxu2 %vm1595_vm0, %v4388_v10  ;;  %v854_v59 = vld [vmem:[%s5347_s1 + $0x138] sm:$0xff]  ;;  %v847_v60 = vld [vmem:[%s5347_s1 + $0x100] sm:$0xff]  ;;  %v849_v35 = vld [vmem:[%s5347_s1 + $0x110] sm:$0xff] }
 0x109   :  { %v1013_v18 = vpop.permute.xlu0 %1012  ;;  %2689 = vmatmul.msk.bf16.gmra.mxu3 %vm1595_vm0, %v4390_v31 }
 0x10a   :  { %v1279_v17 = vpack.c.bf16 %v1145_v7, %v1143_v28  ;;  %v1280_v50 = vpack.c.bf16 %v1146_v9, %v1144_v41  ;;  %v1141_v61 = vmul.f32 %v1013_v18, %v861_v8  ;;  %v1142_v53 = vmul.f32 %v1013_v18, %v862_v2  ;;  %v2517_v7 = vld [vmem:[%s5348_s2 + $0x98] sm:$0xf]  ;;  %v2735_v2 = vld [vmem:[%s5348_s2 + $0xa0] sm:$0xf0] }
 0x10b   :  { %1724 = vmatmul.bf16.gmra.mxu1 %v4345_v62  ;;  %1674 = vmatmul.bf16.gmra.mxu0 %v4347_v36  ;;  %v1127_v18 = vmul.f32 %v978_v0, %v847_v60  ;;  %v4462_v37 = vor.u32 %v2735_v2, %v2517_v7  ;;  %v2768_v60 = vld [vmem:[%s5348_s2 + $0x1a8] sm:$0xf0] }
 0x10c   :  { %1768 = vmatpush.bf16.msrb.mxu1 %v1279_v17  ;;  %2095 = vmatpush.bf16.msrb.mxu2 %v1280_v50  ;;  %v1277_v14 = vpack.c.bf16 %v1141_v61, %v1139_v1  ;;  %v1278_v15 = vpack.c.bf16 %v1142_v53, %v1140_v16  ;;  %v2625_v1 = vld [vmem:[%s5348_s2 + $0x170] sm:$0xf]  ;;  %v2762_v17 = vld [vmem:[%s5348_s2 + $0x178] sm:$0xf0]  ;;  %v1128_v16 = vmul.f32 %v978_v0, %v848_v19  ;;  %v2629_v19 = vld [vmem:[%s5348_s2 + $0x180] sm:$0xf] }
 0x10d   :  { %v2605_v50 = vld [vmem:[%s5348_s2 + $0x150] sm:$0xf]  ;;  %v4464_v32 = vor.u32 %v2762_v17, %v2625_v1  ;;  %v2734_v0 = vld [vmem:[%s5348_s2 + $0x98] sm:$0xf0]  ;;  %v2744_v1 = vld [vmem:[%s5348_s2 + $0xe8] sm:$0xf0] }
 0x10e   :  { %v2661_v17 = vld [vmem:[%s5348_s2 + $0x1b8] sm:$0xf] }
 0x110   :  { %1769 = vmatpush.bf16.msrb.mxu1 %v1277_v14  ;;  %2096 = vmatpush.bf16.msrb.mxu2 %v1278_v15  ;;  %v2758_v15 = vld [vmem:[%s5348_s2 + $0x158] sm:$0xf0] }
 0x111   :  { %v4466_v44 = vor.u32 %v2758_v15, %v2605_v50  ;;  %v2771_v50 = vld [vmem:[%s5348_s2 + $0x1c0] sm:$0xf0] }
 0x112   :  { %v4582_v15 = vor.u32 %v2771_v50, %v2661_v17  ;;  %v2665_v17 = vld [vmem:[%s5348_s2 + $0x1c8] sm:$0xf]  ;;  %v2773_v50 = vld [vmem:[%s5348_s2 + $0x1d0] sm:$0xf0] }
 0x114   :  { %5508 = vst [vmem:[#allocation4_spill] sm:$0xff] %v4582_v15 }
 0x117   :  { %v998_v11 = vpop.permute.xlu1 %997 }
 0x118   :  { %v1135_v42 = vmul.f32 %v998_v11, %v855_v39  ;;  %v1136_v29 = vmul.f32 %v998_v11, %v856_v40  ;;  %2681 = vmatmul.msk.bf16.gmra.mxu2 %vm1595_vm0, %v4462_v37  ;;  %v2738_v39 = vld [vmem:[%s5348_s2 + $0xb8] sm:$0xf0]  ;;  %v2637_v40 = vld [vmem:[%s5348_s2 + $0x188] sm:$0xf]  ;;  %v2765_v11 = vld [vmem:[%s5348_s2 + $0x190] sm:$0xf0] }
 0x119   :  { %2690 = vmatmul.msk.bf16.gmra.mxu3 %vm1595_vm0, %v4464_v32 }
 0x11a   :  { %v988_v48 = vpop.permute.xlu0 %987  ;;  %v1275_v56 = vpack.c.bf16 %v1137_v47, %v1135_v42  ;;  %v1276_v63 = vpack.c.bf16 %v1138_v52, %v1136_v29  ;;  %v2617_v47 = vld [vmem:[%s5348_s2 + $0x168] sm:$0xf]  ;;  %v2761_v52 = vld [vmem:[%s5348_s2 + $0x170] sm:$0xf0]  ;;  %v2497_v42 = vld [vmem:[%s5348_s2 + $0x78] sm:$0xf] }
 0x11b   :  { %1729 = vmatmul.bf16.gmra.mxu1 %v4404_v43  ;;  %1679 = vmatmul.bf16.gmra.mxu0 %v4406_v6  ;;  %v1131_v28 = vmul.f32 %v988_v48, %v851_v57  ;;  %v1132_v41 = vmul.f32 %v988_v48, %v852_v21  ;;  %v2731_v29 = vld [vmem:[%s5348_s2 + $0x80] sm:$0xf0]  ;;  %v4500_v48 = vor.u32 %v2738_v39, %v2529_v38  ;;  %v2541_v21 = vld [vmem:[%s5348_s2 + $0xc8] sm:$0xf]  ;;  %v2673_v38 = vld [vmem:[%s5348_s2 + $0x1d0] sm:$0xf] }
 0x11c   :  { %1770 = vmatpush.bf16.msrb.mxu1 %v1275_v56  ;;  %2097 = vmatpush.bf16.msrb.mxu2 %v1276_v63  ;;  %v4502_v56 = vor.u32 %v2765_v11, %v2637_v40  ;;  %v4504_v63 = vor.u32 %v2761_v52, %v2617_v47  ;;  %v4506_v57 = vor.u32 %v2731_v29, %v2497_v42  ;;  %v2774_v39 = vld [vmem:[%s5348_s2 + $0x1d8] sm:$0xf0]  ;;  %v2653_v40 = vld [vmem:[%s5348_s2 + $0x1b0] sm:$0xf]  ;;  %v2533_v47 = vld [vmem:[%s5348_s2 + $0xc0] sm:$0xf] }
 0x11d   :  { %v2770_v11 = vld [vmem:[%s5348_s2 + $0x1b8] sm:$0xf0]  ;;  %v2740_v52 = vld [vmem:[%s5348_s2 + $0xc8] sm:$0xf0]  ;;  %v4624_v29 = vor.u32 %v2774_v39, %v2673_v38 }
 0x11e   :  { %5506 = vst [vmem:[#allocation2_spill] sm:$0xff] %v4502_v56 }
 0x11f   :  { %v993_v22 = vpop.permute.xlu1 %992  ;;  %5509 = vst [vmem:[#allocation5_spill] sm:$0xff] %v4624_v29 }
 0x120   :  { %v1133_v9 = vmul.f32 %v993_v22, %v853_v58  ;;  %v1134_v8 = vmul.f32 %v993_v22, %v854_v59  ;;  %v2741_v58 = vld [vmem:[%s5348_s2 + $0xd0] sm:$0xf0]  ;;  %v2649_v59 = vld [vmem:[%s5348_s2 + $0x1a0] sm:$0xf] }
 0x121   :  { %v4538_v22 = vor.u32 %v2741_v58, %v2541_v21  ;;  %v4628_v58 = vor.u32 %v2770_v11, %v2653_v40 }
 0x122   :  { %v1273_v61 = vpack.c.bf16 %v1133_v9, %v1131_v28  ;;  %v1274_v53 = vpack.c.bf16 %v1134_v8, %v1132_v41  ;;  %v983_v14 = vpop.permute.xlu0 %982  ;;  %v2764_v28 = vld [vmem:[%s5348_s2 + $0x188] sm:$0xf0]  ;;  %v2509_v41 = vld [vmem:[%s5348_s2 + $0x90] sm:$0xf]  ;;  %v2553_v8 = vld [vmem:[%s5348_s2 + $0xe0] sm:$0xf] }
 0x123   :  { %v1129_v13 = vmul.f32 %v983_v14, %v849_v35  ;;  %v1130_v30 = vmul.f32 %v983_v14, %v850_v5  ;;  %v4540_v35 = vor.u32 %v2768_v60, %v2649_v59  ;;  %v4542_v5 = vor.u32 %v2764_v28, %v2629_v19  ;;  %5511 = vst [vmem:[#allocation7_spill] sm:$0xff] %v4628_v58 }
 0x124   :  { %1771 = vmatpush.bf16.msrb.mxu1 %v1273_v61  ;;  %2098 = vmatpush.bf16.msrb.mxu2 %v1274_v53  ;;  %v4544_v7 = vor.u32 %v2734_v0, %v2509_v41  ;;  %v2521_v61 = vld [vmem:[%s5348_s2 + $0xa8] sm:$0xf]  ;;  %v2737_v53 = vld [vmem:[%s5348_s2 + $0xb0] sm:$0xf0]  ;;  %v4580_v14 = vor.u32 %v2744_v1, %v2553_v8  ;;  %v4632_v60 = vor.u32 %v2740_v52, %v2533_v47  ;;  %v2715_v8 = vld [vmem:[%s5348_s2 + $0x4] sm:$0xf] }
 0x125   :  { %v1271_v51 = vpack.c.bf16 %v1129_v13, %v1127_v18  ;;  %v1272_v26 = vpack.c.bf16 %v1130_v30, %v1128_v16  ;;  %5507 = vst [vmem:[#allocation3_spill] sm:$0xff] %v4540_v35  ;;  %v2641_v18 = vld [vmem:[%s5348_s2 + $0x198] sm:$0xf]  ;;  %v2767_v16 = vld [vmem:[%s5348_s2 + $0x1a0] sm:$0xf0]  ;;  %v4586_v27 = vor.u32 %v2737_v53, %v2521_v61 }
 0x126   :  { %v4584_v23 = vor.u32 %v2767_v16, %v2641_v18  ;;  %v2565_v30 = vld [vmem:[%s5348_s2 + $0xf8] sm:$0xf]  ;;  %v2439_v1 = vld [vmem:[%s5348_s2 + $0xc] sm:$0xf0]  ;;  %v2743_v16 = vld [vmem:[%s5348_s2 + $0xe0] sm:$0xf0] }
 0x127   :  { %v2545_v18 = vld [vmem:[%s5348_s2 + $0xd8] sm:$0xf] }
 0x128   :  { %1772 = vmatpush.bf16.msrb.mxu1 %v1271_v51  ;;  %2099 = vmatpush.bf16.msrb.mxu2 %v1272_v26  ;;  %v2747_v26 = vld [vmem:[%s5348_s2 + $0x100] sm:$0xf0]  ;;  %v4672_v38 = vor.u32 %v2743_v16, %v2545_v18 }
 0x129   :  { %2682 = vmatmul.msk.bf16.gmra.mxu2 %vm1595_vm0, %v4500_v48  ;;  %2691 = vmatmul.msk.bf16.gmra.mxu3 %vm1595_vm0, %v4502_v56  ;;  %v4622_v42 = vor.u32 %v2747_v26, %v2565_v30  ;;  %v2442_v30 = vor.u32 %v2715_v8, %v2439_v1  ;;  %v4670_v26 = vor.u32 %v2773_v50, %v2665_v17  ;;  %v2718_v1 = vld [vmem:[%s5348_s2 + $0x1c] sm:$0xf] }
 0x12b   :  { %1734 = vmatmul.bf16.gmra.mxu1 %v4466_v44  ;;  %1684 = vmatmul.bf16.gmra.mxu0 %v4468_v55  ;;  %5515 = vst [vmem:[#allocation11_spill] sm:$0xff] %v4670_v26 }
 0x139   :  { %2683 = vmatmul.msk.bf16.gmra.mxu2 %vm1595_vm0, %v4538_v22  ;;  %2692 = vmatmul.msk.bf16.gmra.mxu3 %vm1595_vm0, %v4540_v35 }
 0x13b   :  { %1739 = vmatmul.bf16.gmra.mxu1 %v4504_v63  ;;  %1689 = vmatmul.bf16.gmra.mxu0 %v4506_v57  ;;  %v4550_v9 = vpop.f32.mrf.mxu2 }
 0x143   :  { %v4557_v2 = vpop.f32.mrf.mxu2 }
 0x149   :  { %2684 = vmatmul.msk.bf16.gmra.mxu2 %vm1595_vm0, %v4580_v14  ;;  %2693 = vmatmul.msk.bf16.gmra.mxu3 %vm1595_vm0, %v4582_v15 }
 0x14b   :  { %1744 = vmatmul.bf16.gmra.mxu1 %v4542_v5  ;;  %1694 = vmatmul.bf16.gmra.mxu0 %v4544_v7  ;;  %v4592_v13 = vpop.f32.mrf.mxu2 }
 0x153   :  { %v4599_v51 = vpop.f32.mrf.mxu2 }
 0x159   :  { %2685 = vmatmul.msk.bf16.gmra.mxu2 %vm1595_vm0, %v4622_v42  ;;  %2694 = vmatmul.msk.bf16.gmra.mxu3 %vm1595_vm0, %v4624_v29 }
 0x15b   :  { %1749 = vmatmul.bf16.gmra.mxu1 %v4584_v23  ;;  %1699 = vmatmul.bf16.gmra.mxu0 %v4586_v27  ;;  %v4640_v19 = vpop.f32.mrf.mxu2 }
 0x15c   :  { %v4642_v28 = vpop.f32.mrf.mxu3 }
 0x15d   :  { %5512 = vst [vmem:[#allocation8_spill] sm:$0xff] %v4642_v28 }
 0x163   :  { %v4666_v61 = vpop.f32.mrf.mxu2 }
 0x164   :  { %v4668_v53 = vpop.f32.mrf.mxu3 }
 0x165   :  { %5514 = vst [vmem:[#allocation10_spill] sm:$0xff] %v4668_v53 }
 0x167   :  { %v4626_v21 = vpop.f32.mrf.mxu1  ;;  %v4630_v59 = vpop.f32.mrf.mxu0 }
 0x168   :  { %5510 = vst [vmem:[#allocation6_spill] sm:$0xff] %v4626_v21 }
 0x169   :  { %1991 = vmatmul.bf16.vlgmr.msrb.gmra.mxu3 %v4199_v25  ;;  %2100 = vmatmul.bf16.vlgmr.msrb.gmra.mxu2 %v2442_v30  ;;  %v2451_v25 = vld [vmem:[%s5348_s2 + $0x24] sm:$0xf0] }
 0x16a   :  { %v2454_v18 = vor.u32 %v2718_v1, %v2451_v25  ;;  %v2721_v1 = vld [vmem:[%s5348_s2 + $0x34] sm:$0xf] }
 0x16b   :  { %1754 = vmatmul.bf16.gmra.mxu1 %v4628_v58  ;;  %1704 = vmatmul.bf16.gmra.mxu0 %v4632_v60  ;;  %v4681_v11 = vpop.f32.mrf.mxu2 }
 0x16c   :  { %v4683_v47 = vpop.f32.mrf.mxu3 }
 0x16d   :  { %5517 = vst [vmem:[#allocation13_spill] sm:$0xff] %v4683_v47 }
 0x16f   :  { %v4644_v41 = vpop.f32.mrf.mxu1  ;;  %v4646_v0 = vpop.f32.mrf.mxu0 }
 0x170   :  { %5513 = vst [vmem:[#allocation9_spill] sm:$0xff] %v4644_v41 }
 0x173   :  { %v4695_v17 = vpop.f32.mrf.mxu2 }
 0x174   :  { %v4697_v50 = vpop.f32.mrf.mxu3 }
 0x175   :  { %5519 = vst [vmem:[#allocation15_spill] sm:$0xff] %v4697_v50 }
 0x178   :  { %v4674_v39 = vpop.f32.mrf.mxu1  ;;  %v4676_v40 = vpop.f32.mrf.mxu0 }
 0x179   :  { %5516 = vst [vmem:[#allocation12_spill] sm:$0xff] %v4674_v39  ;;  %1996 = vmatmul.bf16.gmra.mxu3 %v4282_v12  ;;  %2105 = vmatmul.bf16.gmra.mxu2 %v2454_v18  ;;  %v2463_v12 = vld [vmem:[%s5348_s2 + $0x3c] sm:$0xf0] }
 0x17b   :  { %1759 = vmatmul.bf16.gmra.mxu1 %v4670_v26  ;;  %1709 = vmatmul.bf16.gmra.mxu0 %v4672_v38  ;;  %v4706_v53 = vpop.f32.mrf.mxu2 }
 0x180   :  { %v4685_v52 = vpop.f32.mrf.mxu1  ;;  %v4687_v8 = vpop.f32.mrf.mxu0 }
 0x181   :  { %5518 = vst [vmem:[#allocation14_spill] sm:$0xff] %v4685_v52  ;;  %v4708_v52 = vpop.f32.mrf.mxu3 }
 0x182   :  { %5521 = vst [vmem:[#allocation17_spill] sm:$0xff] %v4708_v52 }
 0x188   :  { %v4699_v16 = vpop.f32.mrf.mxu1  ;;  %v4701_v47 = vpop.f32.mrf.mxu0 }
 0x189   :  { %5520 = vst [vmem:[#allocation16_spill] sm:$0xff] %v4699_v16  ;;  %v4722_v25 = vpop.f32.mrf.mxu3  ;;  %2001 = vmatmul.bf16.gmra.mxu3 %v4347_v36  ;;  %v2475_v36 = vld [vmem:[%s5348_s2 + $0x54] sm:$0xf0] }
 0x18a   :  { %5523 = vst [vmem:[#allocation19_spill] sm:$0xff] %v4722_v25 }
 0x18b   :  { %1773 = vmatmul.bf16.vlgmr.msrb.gmra.mxu1 %v2442_v30  ;;  %2695 = vmatmul.msk.bf16.vlgmr.msrb.gmra.mxu0 %vm1595_vm0, %v4101_v34  ;;  %v4720_v30 = vpop.f32.mrf.mxu2  ;;  %v2466_v34 = vor.u32 %v2721_v1, %v2463_v12  ;;  %v2724_v1 = vld [vmem:[%s5348_s2 + $0x4c] sm:$0xf] }
 0x18d   :  { %2110 = vmatmul.bf16.gmra.mxu2 %v2466_v34 }
 0x190   :  { %v4710_v29 = vpop.f32.mrf.mxu1  ;;  %v4712_v28 = vpop.f32.mrf.mxu0 }
 0x191   :  { %5522 = vst [vmem:[#allocation18_spill] sm:$0xff] %v4710_v29  ;;  %v4733_v16 = vpop.f32.mrf.mxu3 }
 0x192   :  { %5525 = vst [vmem:[#allocation21_spill] sm:$0xff] %v4733_v16 }
 0x193   :  { %v4731_v29 = vpop.f32.mrf.mxu2 }
 0x198   :  { %v4724_v50 = vpop.f32.mrf.mxu1  ;;  %v4726_v52 = vpop.f32.mrf.mxu0 }
 0x199   :  { %5524 = vst [vmem:[#allocation20_spill] sm:$0xff] %v4724_v50  ;;  %v4747_v12 = vpop.f32.mrf.mxu3  ;;  %2006 = vmatmul.bf16.gmra.mxu3 %v4406_v6  ;;  %v2487_v6 = vld [vmem:[%s5348_s2 + $0x6c] sm:$0xf0] }
 0x19a   :  { %5527 = vst [vmem:[#allocation23_spill] sm:$0xff] %v4747_v12 }
 0x19b   :  { %1778 = vmatmul.bf16.gmra.mxu1 %v2454_v18  ;;  %2696 = vmatmul.msk.bf16.gmra.mxu0 %vm1595_vm0, %v4129_v54  ;;  %v4745_v18 = vpop.f32.mrf.mxu2  ;;  %v2478_v54 = vor.u32 %v2724_v1, %v2475_v36  ;;  %v2727_v1 = vld [vmem:[%s5348_s2 + $0x64] sm:$0xf] }
 0x19d   :  { %2115 = vmatmul.bf16.gmra.mxu2 %v2478_v54 }
 0x1a0   :  { %v4735_v39 = vpop.f32.mrf.mxu1  ;;  %v4737_v41 = vpop.f32.mrf.mxu0 }
 0x1a1   :  { %5526 = vst [vmem:[#allocation22_spill] sm:$0xff] %v4735_v39  ;;  %v4758_v50 = vpop.f32.mrf.mxu3 }
 0x1a2   :  { %5529 = vst [vmem:[#allocation25_spill] sm:$0xff] %v4758_v50 }
 0x1a3   :  { %v4756_v39 = vpop.f32.mrf.mxu2 }
 0x1a8   :  { %v4749_v25 = vpop.f32.mrf.mxu1  ;;  %v4751_v16 = vpop.f32.mrf.mxu0 }
 0x1a9   :  { %5528 = vst [vmem:[#allocation24_spill] sm:$0xff] %v4749_v25  ;;  %v4772_v36 = vpop.f32.mrf.mxu3  ;;  %2011 = vmatmul.bf16.gmra.mxu3 %v4468_v55  ;;  %v2499_v55 = vld [vmem:[%s5348_s2 + $0x84] sm:$0xf0] }
 0x1aa   :  { %5531 = vst [vmem:[#allocation27_spill] sm:$0xff] %v4772_v36 }
 0x1ab   :  { %1783 = vmatmul.bf16.gmra.mxu1 %v2466_v34  ;;  %2697 = vmatmul.msk.bf16.gmra.mxu0 %vm1595_vm0, %v4192_v3  ;;  %v4770_v34 = vpop.f32.mrf.mxu2  ;;  %v2490_v3 = vor.u32 %v2727_v1, %v2487_v6  ;;  %v2730_v1 = vld [vmem:[%s5348_s2 + $0x7c] sm:$0xf] }
 0x1ad   :  { %2120 = vmatmul.bf16.gmra.mxu2 %v2490_v3 }
 0x1b0   :  { %v4760_v15 = vpop.f32.mrf.mxu1  ;;  %v4762_v26 = vpop.f32.mrf.mxu0 }
 0x1b1   :  { %5530 = vst [vmem:[#allocation26_spill] sm:$0xff] %v4760_v15  ;;  %v4783_v25 = vpop.f32.mrf.mxu3 }
 0x1b2   :  { %5533 = vst [vmem:[#allocation29_spill] sm:$0xff] %v4783_v25 }
 0x1b3   :  { %v4781_v15 = vpop.f32.mrf.mxu2 }
 0x1b8   :  { %v4774_v12 = vpop.f32.mrf.mxu1  ;;  %v4776_v50 = vpop.f32.mrf.mxu0 }
 0x1b9   :  { %5532 = vst [vmem:[#allocation28_spill] sm:$0xff] %v4774_v12  ;;  %v4797_v6 = vpop.f32.mrf.mxu3  ;;  %2016 = vmatmul.bf16.gmra.mxu3 %v4506_v57  ;;  %v2511_v57 = vld [vmem:[%s5348_s2 + $0x9c] sm:$0xf0] }
 0x1ba   :  { %5535 = vst [vmem:[#allocation31_spill] sm:$0xff] %v4797_v6 }
 0x1bb   :  { %1788 = vmatmul.bf16.gmra.mxu1 %v2478_v54  ;;  %2698 = vmatmul.msk.bf16.gmra.mxu0 %vm1595_vm0, %v4264_v49  ;;  %v4795_v54 = vpop.f32.mrf.mxu2  ;;  %v2502_v49 = vor.u32 %v2730_v1, %v2499_v55  ;;  %v2733_v1 = vld [vmem:[%s5348_s2 + $0x94] sm:$0xf] }
 0x1bd   :  { %2125 = vmatmul.bf16.gmra.mxu2 %v2502_v49 }
 0x1c0   :  { %v4785_v21 = vpop.f32.mrf.mxu1  ;;  %v4787_v35 = vpop.f32.mrf.mxu0 }
 0x1c1   :  { %5534 = vst [vmem:[#allocation30_spill] sm:$0xff] %v4785_v21  ;;  %v4808_v12 = vpop.f32.mrf.mxu3 }
 0x1c2   :  { %5538 = vst [vmem:[#allocation34_spill] sm:$0xff] %v4808_v12 }
 0x1c3   :  { %v4806_v21 = vpop.f32.mrf.mxu2 }
 0x1c4   :  { %5537 = vst [vmem:[#allocation33_spill] sm:$0xff] %v4806_v21 }
 0x1c8   :  { %v4799_v36 = vpop.f32.mrf.mxu1  ;;  %v4801_v25 = vpop.f32.mrf.mxu0 }
 0x1c9   :  { %5536 = vst [vmem:[#allocation32_spill] sm:$0xff] %v4799_v36  ;;  %v4822_v55 = vpop.f32.mrf.mxu3  ;;  %2021 = vmatmul.bf16.gmra.mxu3 %v4544_v7  ;;  %v2523_v7 = vld [vmem:[%s5348_s2 + $0xb4] sm:$0xf0] }
 0x1ca   :  { %5541 = vst [vmem:[#allocation37_spill] sm:$0xff] %v4822_v55 }
 0x1cb   :  { %1793 = vmatmul.bf16.gmra.mxu1 %v2490_v3  ;;  %2699 = vmatmul.msk.bf16.gmra.mxu0 %vm1595_vm0, %v4335_v24  ;;  %v4820_v3 = vpop.f32.mrf.mxu2  ;;  %v2514_v24 = vor.u32 %v2733_v1, %v2511_v57  ;;  %v2736_v1 = vld [vmem:[%s5348_s2 + $0xac] sm:$0xf] }
 0x1cc   :  { %5540 = vst [vmem:[#allocation36_spill] sm:$0xff] %v4820_v3 }
 0x1cd   :  { %2130 = vmatmul.bf16.gmra.mxu2 %v2514_v24 }
 0x1d0   :  { %v4810_v58 = vpop.f32.mrf.mxu1  ;;  %v4812_v56 = vpop.f32.mrf.mxu0 }
 0x1d1   :  { %5539 = vst [vmem:[#allocation35_spill] sm:$0xff] %v4810_v58  ;;  %v4833_v36 = vpop.f32.mrf.mxu3 }
 0x1d2   :  { %5544 = vst [vmem:[#allocation40_spill] sm:$0xff] %v4833_v36 }
 0x1d3   :  { %v4831_v58 = vpop.f32.mrf.mxu2 }
 0x1d4   :  { %5543 = vst [vmem:[#allocation39_spill] sm:$0xff] %v4831_v58 }
 0x1d8   :  { %v4824_v6 = vpop.f32.mrf.mxu1  ;;  %v4826_v12 = vpop.f32.mrf.mxu0 }
 0x1d9   :  { %5542 = vst [vmem:[#allocation38_spill] sm:$0xff] %v4824_v6  ;;  %v4847_v57 = vpop.f32.mrf.mxu3  ;;  %2026 = vmatmul.bf16.gmra.mxu3 %v4586_v27  ;;  %v2535_v27 = vld [vmem:[%s5348_s2 + $0xcc] sm:$0xf0] }
 0x1da   :  { %5547 = vst [vmem:[#allocation43_spill] sm:$0xff] %v4847_v57 }
 0x1db   :  { %1798 = vmatmul.bf16.gmra.mxu1 %v2502_v49  ;;  %2700 = vmatmul.msk.bf16.gmra.mxu0 %vm1595_vm0, %v4388_v10  ;;  %v4845_v49 = vpop.f32.mrf.mxu2  ;;  %v2526_v10 = vor.u32 %v2736_v1, %v2523_v7  ;;  %v2739_v1 = vld [vmem:[%s5348_s2 + $0xc4] sm:$0xf] }
 0x1dc   :  { %5546 = vst [vmem:[#allocation42_spill] sm:$0xff] %v4845_v49 }
 0x1dd   :  { %2135 = vmatmul.bf16.gmra.mxu2 %v2526_v10 }
 0x1e0   :  { %v4835_v21 = vpop.f32.mrf.mxu1  ;;  %v4837_v3 = vpop.f32.mrf.mxu0 }
 0x1e1   :  { %5545 = vst [vmem:[#allocation41_spill] sm:$0xff] %v4835_v21  ;;  %v4858_v6 = vpop.f32.mrf.mxu3 }
 0x1e2   :  { %5550 = vst [vmem:[#allocation46_spill] sm:$0xff] %v4858_v6 }
 0x1e3   :  { %v4856_v21 = vpop.f32.mrf.mxu2 }
 0x1e4   :  { %5549 = vst [vmem:[#allocation45_spill] sm:$0xff] %v4856_v21 }
 0x1e8   :  { %v4849_v55 = vpop.f32.mrf.mxu1  ;;  %v4851_v36 = vpop.f32.mrf.mxu0 }
 0x1e9   :  { %5548 = vst [vmem:[#allocation44_spill] sm:$0xff] %v4849_v55  ;;  %v4872_v7 = vpop.f32.mrf.mxu3  ;;  %2031 = vmatmul.bf16.gmra.mxu3 %v4632_v60 }
 0x1ea   :  { %5554 = vst [vmem:[#allocation50_spill] sm:$0xff] %v4872_v7 }
 0x1eb   :  { %1803 = vmatmul.bf16.gmra.mxu1 %v2514_v24  ;;  %2701 = vmatmul.msk.bf16.gmra.mxu0 %vm1595_vm0, %v4462_v37  ;;  %v4870_v24 = vpop.f32.mrf.mxu2  ;;  %v2538_v37 = vor.u32 %v2739_v1, %v2535_v27  ;;  %v2742_v1 = vld [vmem:[%s5348_s2 + $0xdc] sm:$0xf]  ;;  %v2547_v27 = vld [vmem:[%s5348_s2 + $0xe4] sm:$0xf0] }
 0x1ec   :  { %5553 = vst [vmem:[#allocation49_spill] sm:$0xff] %v4870_v24 }
 0x1ed   :  { %2140 = vmatmul.bf16.gmra.mxu2 %v2538_v37 }
 0x1f0   :  { %v4860_v58 = vpop.f32.mrf.mxu1  ;;  %v4862_v49 = vpop.f32.mrf.mxu0 }
 0x1f1   :  { %5551 = vst [vmem:[#allocation47_spill] sm:$0xff] %v4860_v58  ;;  %v1992_v58 = vpop.f32.mrf.mxu3 }
 0x1f2   :  { %5552 = vst [vmem:[#allocation48_spill] sm:$0xff] %v4862_v49 }
 0x1f3   :  { %v2101_v55 = vpop.f32.mrf.mxu2 }
 0x1f8   :  { %v4874_v57 = vpop.f32.mrf.mxu1  ;;  %v4876_v6 = vpop.f32.mrf.mxu0 }
 0x1f9   :  { %5555 = vst [vmem:[#allocation51_spill] sm:$0xff] %v4874_v57  ;;  %v1994_v60 = vpop.f32.mrf.mxu3  ;;  %v2550_v57 = vor.u32 %v2742_v1, %v2547_v27  ;;  %2036 = vmatmul.bf16.gmra.mxu3 %v4672_v38 }
 0x1fa   :  { %5556 = vst [vmem:[#allocation52_spill] sm:$0xff] %v4876_v6 }
 0x1fb   :  { %1808 = vmatmul.bf16.gmra.mxu1 %v2526_v10  ;;  %2702 = vmatmul.msk.bf16.gmra.mxu0 %vm1595_vm0, %v4500_v48  ;;  %v2103_v7 = vpop.f32.mrf.mxu2  ;;  %v2102_v10 = vadd.f32 %v2101_v55, %v1992_v58 }
 0x1fd   :  { %2145 = vmatmul.bf16.gmra.mxu2 %v2550_v57 }
 0x200   :  { %v4881_v21 = vpop.f32.mrf.mxu1  ;;  %v4883_v49 = vpop.f32.mrf.mxu0 }
 0x201   :  { %5557 = vst [vmem:[#allocation53_spill] sm:$0xff] %v4881_v21  ;;  %v1997_v58 = vpop.f32.mrf.mxu3 }
 0x202   :  { %5558 = vst [vmem:[#allocation54_spill] sm:$0xff] %v4883_v49 }
 0x203   :  { %v2106_v55 = vpop.f32.mrf.mxu2 }
 0x208   :  { %v1774_v24 = vpop.f32.mrf.mxu1  ;;  %v2210_v48 = vpop.f32.mrf.mxu0 }
 0x209   :  { %v1775_v6 = vadd.f32 %v1774_v24, %v4630_v59  ;;  %v2211_v21 = vadd.f32 %v2210_v48, %v2102_v10  ;;  %v2104_v59 = vadd.f32 %v2103_v7, %v1994_v60  ;;  %2041 = vmatmul.bf16.gmra.mxu3 %v4197_v33 }
 0x20b   :  { %v1884_v49 = vadd.f32 %v4550_v9, %v1775_v6  ;;  %1813 = vmatmul.bf16.gmra.mxu1 %v2538_v37  ;;  %2312 = vst.msk [vmem:[%s5349_s3 + $0x8] sm:$0xff] %vm2311_vm6, %v2211_v21  ;;  %2703 = vmatmul.msk.bf16.gmra.mxu0 %vm1595_vm0, %v4538_v22  ;;  %v2745_v37 = vld [vmem:[%s5348_s2 + $0xf4] sm:$0xf]  ;;  %v2559_v22 = vld [vmem:[%s5348_s2 + $0xfc] sm:$0xf0]  ;;  %v2108_v7 = vpop.f32.mrf.mxu2 }
 0x20c   :  { %v2562_v1 = vor.u32 %v2745_v37, %v2559_v22 }
 0x20d   :  { %2310 = vst [vmem:[%s5349_s3] sm:$0xff] %v1884_v49  ;;  %v1999_v49 = vpop.f32.mrf.mxu3 }
 0x20e   :  { %2150 = vmatmul.bf16.gmra.mxu2 %v2562_v1 }
 0x210   :  { %v1776_v38 = vpop.f32.mrf.mxu1  ;;  %v2212_v24 = vpop.f32.mrf.mxu0 }
 0x211   :  { %v1777_v9 = vadd.f32 %v1776_v38, %v4646_v0  ;;  %v2213_v6 = vadd.f32 %v2212_v24, %v2104_v59  ;;  %v2107_v0 = vadd.f32 %v2106_v55, %v1997_v58  ;;  %v2748_v38 = vld [vmem:[%s5348_s2 + $0x10c] sm:$0xf] }
 0x213   :  { %v1886_v21 = vadd.f32 %v4557_v2, %v1777_v9  ;;  %2314 = vst.msk [vmem:[%s5349_s3 + $0x18] sm:$0xff] %vm2311_vm6, %v2213_v6  ;;  %v2111_v55 = vpop.f32.mrf.mxu2 }
 0x215   :  { %2313 = vst [vmem:[%s5349_s3 + $0x10] sm:$0xff] %v1886_v21  ;;  %v2002_v58 = vpop.f32.mrf.mxu3 }
 0x218   :  { %v1779_v27 = vpop.f32.mrf.mxu1  ;;  %v2215_v60 = vpop.f32.mrf.mxu0 }
 0x219   :  { %v1780_v10 = vadd.f32 %v1779_v27, %v4676_v40  ;;  %v2216_v48 = vadd.f32 %v2215_v60, %v2107_v0  ;;  %v2109_v40 = vadd.f32 %v2108_v7, %v1999_v49  ;;  %2046 = vmatmul.bf16.gmra.mxu3 %v4280_v4 }
 0x21b   :  { %v1889_v2 = vadd.f32 %v4592_v13, %v1780_v10  ;;  %1818 = vmatmul.bf16.gmra.mxu1 %v2550_v57  ;;  %2316 = vst.msk [vmem:[%s5349_s3 + $0x28] sm:$0xff] %vm2311_vm6, %v2216_v48  ;;  %2704 = vmatmul.msk.bf16.gmra.mxu0 %vm1595_vm0, %v4580_v14  ;;  %v2571_v14 = vld [vmem:[%s5348_s2 + $0x114] sm:$0xf0]  ;;  %v2113_v6 = vpop.f32.mrf.mxu2  ;;  %v2751_v10 = vld [vmem:[%s5348_s2 + $0x124] sm:$0xf] }
 0x21c   :  { %v2574_v37 = vor.u32 %v2748_v38, %v2571_v14 }
 0x21d   :  { %2315 = vst [vmem:[%s5349_s3 + $0x20] sm:$0xff] %v1889_v2  ;;  %v2004_v9 = vpop.f32.mrf.mxu3 }
 0x21e   :  { %2155 = vmatmul.bf16.gmra.mxu2 %v2574_v37 }
 0x220   :  { %v1781_v33 = vpop.f32.mrf.mxu1  ;;  %v2217_v59 = vpop.f32.mrf.mxu0 }
 0x221   :  { %v1782_v13 = vadd.f32 %v1781_v33, %v4687_v8  ;;  %v2218_v57 = vadd.f32 %v2217_v59, %v2109_v40  ;;  %v2112_v8 = vadd.f32 %v2111_v55, %v2002_v58 }
 0x223   :  { %v1891_v24 = vadd.f32 %v4599_v51, %v1782_v13  ;;  %2318 = vst.msk [vmem:[%s5349_s3 + $0x38] sm:$0xff] %vm2311_vm6, %v2218_v57  ;;  %v2116_v27 = vpop.f32.mrf.mxu2 }
 0x225   :  { %2317 = vst [vmem:[%s5349_s3 + $0x30] sm:$0xff] %v1891_v24  ;;  %v2007_v0 = vpop.f32.mrf.mxu3 }
 0x228   :  { %v1784_v22 = vpop.f32.mrf.mxu1  ;;  %v2220_v21 = vpop.f32.mrf.mxu0 }
 0x229   :  { %v1785_v49 = vadd.f32 %v1784_v22, %v4701_v47  ;;  %v2221_v7 = vadd.f32 %v2220_v21, %v2112_v8  ;;  %v2114_v47 = vadd.f32 %v2113_v6, %v2004_v9  ;;  %2051 = vmatmul.bf16.gmra.mxu3 %v4345_v62  ;;  %v2754_v9 = vld [vmem:[%s5348_s2 + $0x13c] sm:$0xf] }
 0x22b   :  { %v1894_v51 = vadd.f32 %v4640_v19, %v1785_v49  ;;  %1823 = vmatmul.bf16.gmra.mxu1 %v2562_v1  ;;  %2320 = vst.msk [vmem:[%s5349_s3 + $0x48] sm:$0xff] %vm2311_vm6, %v2221_v7  ;;  %2705 = vmatmul.msk.bf16.gmra.mxu0 %vm1595_vm0, %v4622_v42  ;;  %v2583_v42 = vld [vmem:[%s5348_s2 + $0x12c] sm:$0xf0]  ;;  %v2118_v58 = vpop.f32.mrf.mxu2 }
 0x22c   :  { %v2586_v55 = vor.u32 %v2751_v10, %v2583_v42 }
 0x22d   :  { %2319 = vst [vmem:[%s5349_s3 + $0x40] sm:$0xff] %v1894_v51  ;;  %v2009_v2 = vpop.f32.mrf.mxu3 }
 0x22e   :  { %2160 = vmatmul.bf16.gmra.mxu2 %v2586_v55 }
 0x230   :  { %v1786_v4 = vpop.f32.mrf.mxu1  ;;  %v2222_v60 = vpop.f32.mrf.mxu0 }
 0x231   :  { %v1787_v19 = vadd.f32 %v1786_v4, %v4712_v28  ;;  %v2223_v1 = vadd.f32 %v2222_v60, %v2114_v47  ;;  %v2117_v28 = vadd.f32 %v2116_v27, %v2007_v0  ;;  %v2757_v60 = vld [vmem:[%s5348_s2 + $0x154] sm:$0xf] }
 0x233   :  { %v1896_v48 = vadd.f32 %v4666_v61, %v1787_v19  ;;  %2322 = vst.msk [vmem:[%s5349_s3 + $0x58] sm:$0xff] %vm2311_vm6, %v2223_v1  ;;  %v2121_v38 = vpop.f32.mrf.mxu2 }
 0x235   :  { %2321 = vst [vmem:[%s5349_s3 + $0x50] sm:$0xff] %v1896_v48  ;;  %v2012_v57 = vpop.f32.mrf.mxu3 }
 0x238   :  { %v1789_v40 = vpop.f32.mrf.mxu1  ;;  %v2225_v33 = vpop.f32.mrf.mxu0 }
 0x239   :  { %v1790_v59 = vadd.f32 %v1789_v40, %v4726_v52  ;;  %v2226_v13 = vadd.f32 %v2225_v33, %v2117_v28  ;;  %v2119_v52 = vadd.f32 %v2118_v58, %v2009_v2  ;;  %2056 = vmatmul.bf16.gmra.mxu3 %v4404_v43 }
 0x23b   :  { %v1899_v61 = vadd.f32 %v4681_v11, %v1790_v59  ;;  %1828 = vmatmul.bf16.gmra.mxu1 %v2574_v37  ;;  %2324 = vst.msk [vmem:[%s5349_s3 + $0x68] sm:$0xff] %vm2311_vm6, %v2226_v13  ;;  %2706 = vmatmul.msk.bf16.gmra.mxu0 %vm1595_vm0, %v4201_v46  ;;  %v2595_v46 = vld [vmem:[%s5348_s2 + $0x144] sm:$0xf0]  ;;  %v2123_v37 = vpop.f32.mrf.mxu2  ;;  %v2760_v13 = vld [vmem:[%s5348_s2 + $0x16c] sm:$0xf] }
 0x23c   :  { %v2598_v22 = vor.u32 %v2754_v9, %v2595_v46 }
 0x23d   :  { %2323 = vst [vmem:[%s5349_s3 + $0x60] sm:$0xff] %v1899_v61  ;;  %v2014_v8 = vpop.f32.mrf.mxu3 }
 0x23e   :  { %2165 = vmatmul.bf16.gmra.mxu2 %v2598_v22 }
 0x240   :  { %v1791_v62 = vpop.f32.mrf.mxu1  ;;  %v2227_v14 = vpop.f32.mrf.mxu0 }
 0x241   :  { %v1792_v11 = vadd.f32 %v1791_v62, %v4737_v41  ;;  %v2228_v24 = vadd.f32 %v2227_v14, %v2119_v52  ;;  %v2122_v41 = vadd.f32 %v2121_v38, %v2012_v57 }
 0x243   :  { %v1901_v6 = vadd.f32 %v4695_v17, %v1792_v11  ;;  %2326 = vst.msk [vmem:[%s5349_s3 + $0x78] sm:$0xff] %vm2311_vm6, %v2228_v24  ;;  %v2126_v27 = vpop.f32.mrf.mxu2 }
 0x245   :  { %2325 = vst [vmem:[%s5349_s3 + $0x70] sm:$0xff] %v1901_v6  ;;  %v2017_v0 = vpop.f32.mrf.mxu3 }
 0x248   :  { %v1794_v21 = vpop.f32.mrf.mxu1  ;;  %v2230_v49 = vpop.f32.mrf.mxu0 }
 0x249   :  { %v1795_v7 = vadd.f32 %v1794_v21, %v4751_v16  ;;  %v2231_v51 = vadd.f32 %v2230_v49, %v2122_v41  ;;  %v2124_v16 = vadd.f32 %v2123_v37, %v2014_v8  ;;  %2061 = vmatmul.bf16.gmra.mxu3 %v4466_v44  ;;  %v2763_v37 = vld [vmem:[%s5348_s2 + $0x184] sm:$0xf] }
 0x24b   :  { %v1904_v17 = vadd.f32 %v4706_v53, %v1795_v7  ;;  %1833 = vmatmul.bf16.gmra.mxu1 %v2586_v55  ;;  %2328 = vst.msk [vmem:[%s5349_s3 + $0x88] sm:$0xff] %vm2311_vm6, %v2231_v51  ;;  %2707 = vmatmul.msk.bf16.gmra.mxu0 %vm1595_vm0, %v4278_v20  ;;  %v2607_v20 = vld [vmem:[%s5348_s2 + $0x15c] sm:$0xf0]  ;;  %v2128_v10 = vpop.f32.mrf.mxu2 }
 0x24c   :  { %v2610_v42 = vor.u32 %v2757_v60, %v2607_v20 }
 0x24d   :  { %2327 = vst [vmem:[%s5349_s3 + $0x80] sm:$0xff] %v1904_v17  ;;  %v2019_v1 = vpop.f32.mrf.mxu3 }
 0x24e   :  { %2170 = vmatmul.bf16.gmra.mxu2 %v2610_v42 }
 0x250   :  { %v1796_v43 = vpop.f32.mrf.mxu1  ;;  %v2232_v47 = vpop.f32.mrf.mxu0 }
 0x251   :  { %v1797_v53 = vadd.f32 %v1796_v43, %v4762_v26  ;;  %v2233_v4 = vadd.f32 %v2232_v47, %v2124_v16  ;;  %v2127_v26 = vadd.f32 %v2126_v27, %v2017_v0 }
 0x253   :  { %v1906_v19 = vadd.f32 %v4720_v30, %v1797_v53  ;;  %2330 = vst.msk [vmem:[%s5349_s3 + $0x98] sm:$0xff] %vm2311_vm6, %v2233_v4  ;;  %v2131_v40 = vpop.f32.mrf.mxu2  ;;  %v2766_v53 = vld [vmem:[%s5348_s2 + $0x19c] sm:$0xf] }
 0x255   :  { %2329 = vst [vmem:[%s5349_s3 + $0x90] sm:$0xff] %v1906_v19  ;;  %v2022_v55 = vpop.f32.mrf.mxu3 }
 0x258   :  { %v1799_v48 = vpop.f32.mrf.mxu1  ;;  %v2235_v2 = vpop.f32.mrf.mxu0 }
 0x259   :  { %v1800_v58 = vadd.f32 %v1799_v48, %v4776_v50  ;;  %v2236_v28 = vadd.f32 %v2235_v2, %v2127_v26  ;;  %v2129_v50 = vadd.f32 %v2128_v10, %v2019_v1  ;;  %2066 = vmatmul.bf16.gmra.mxu3 %v4504_v63  ;;  %v5560_v2 = vld [vmem:[#allocation2_spill] sm:$0xff] }
 0x25b   :  { %v1909_v30 = vadd.f32 %v4731_v29, %v1800_v58  ;;  %1838 = vmatmul.bf16.gmra.mxu1 %v2598_v22  ;;  %2332 = vst.msk [vmem:[%s5349_s3 + $0xa8] sm:$0xff] %vm2311_vm6, %v2236_v28  ;;  %2708 = vmatmul.msk.bf16.gmra.mxu0 %vm1595_vm0, %v4340_v45  ;;  %v2619_v45 = vld [vmem:[%s5348_s2 + $0x174] sm:$0xf0]  ;;  %v2133_v38 = vpop.f32.mrf.mxu2 }
 0x25c   :  { %v2622_v52 = vor.u32 %v2760_v13, %v2619_v45 }
 0x25d   :  { %2331 = vst [vmem:[%s5349_s3 + $0xa0] sm:$0xff] %v1909_v30  ;;  %v2024_v57 = vpop.f32.mrf.mxu3 }
 0x25e   :  { %2175 = vmatmul.bf16.gmra.mxu2 %v2622_v52 }
 0x260   :  { %v1801_v44 = vpop.f32.mrf.mxu1  ;;  %v2237_v33 = vpop.f32.mrf.mxu0 }
 0x261   :  { %v1802_v29 = vadd.f32 %v1801_v44, %v4787_v35  ;;  %v2238_v59 = vadd.f32 %v2237_v33, %v2129_v50  ;;  %v2132_v35 = vadd.f32 %v2131_v40, %v2022_v55  ;;  %v5561_v55 = vld [vmem:[#allocation48_spill] sm:$0xff]  ;;  %v2655_v33 = vld [vmem:[%s5348_s2 + $0x1bc] sm:$0xf0] }
 0x262   :  { %v2769_v44 = vld [vmem:[%s5348_s2 + $0x1b4] sm:$0xf] }
 0x263   :  { %v1911_v61 = vadd.f32 %v4745_v18, %v1802_v29  ;;  %2334 = vst.msk [vmem:[%s5349_s3 + $0xb8] sm:$0xff] %vm2311_vm6, %v2238_v59  ;;  %v2136_v46 = vpop.f32.mrf.mxu2  ;;  %v5562_v29 = vld [vmem:[#allocation36_spill] sm:$0xff] }
 0x265   :  { %2333 = vst [vmem:[%s5349_s3 + $0xb0] sm:$0xff] %v1911_v61  ;;  %v2027_v9 = vpop.f32.mrf.mxu3 }
 0x268   :  { %v1804_v62 = vpop.f32.mrf.mxu1  ;;  %v2240_v14 = vpop.f32.mrf.mxu0 }
 0x269   :  { %v1805_v11 = vadd.f32 %v1804_v62, %v4801_v25  ;;  %v2241_v24 = vadd.f32 %v2240_v14, %v2132_v35  ;;  %v2134_v25 = vadd.f32 %v2133_v38, %v2024_v57  ;;  %2071 = vmatmul.bf16.gmra.mxu3 %v4542_v5  ;;  %v2658_v57 = vor.u32 %v2769_v44, %v2655_v33 }
 0x26b   :  { %v1914_v18 = vadd.f32 %v4756_v39, %v1805_v11  ;;  %1843 = vmatmul.bf16.gmra.mxu1 %v2610_v42  ;;  %2336 = vst.msk [vmem:[%s5349_s3 + $0xc8] sm:$0xff] %vm2311_vm6, %v2241_v24  ;;  %2709 = vmatmul.msk.bf16.gmra.mxu0 %vm1595_vm0, %v4390_v31  ;;  %v2631_v31 = vld [vmem:[%s5348_s2 + $0x18c] sm:$0xf0]  ;;  %v2138_v21 = vpop.f32.mrf.mxu2  ;;  %v5564_v11 = vld [vmem:[#allocation7_spill] sm:$0xff] }
 0x26c   :  { %v2634_v49 = vor.u32 %v2763_v37, %v2631_v31  ;;  %v5565_v24 = vld [vmem:[#allocation39_spill] sm:$0xff] }
 0x26d   :  { %2335 = vst [vmem:[%s5349_s3 + $0xc0] sm:$0xff] %v1914_v18  ;;  %v2029_v22 = vpop.f32.mrf.mxu3 }
 0x26e   :  { %2180 = vmatmul.bf16.gmra.mxu2 %v2634_v49 }
 0x270   :  { %v1806_v63 = vpop.f32.mrf.mxu1  ;;  %v2242_v6 = vpop.f32.mrf.mxu0 }
 0x271   :  { %v1807_v39 = vadd.f32 %v1806_v63, %v4812_v56  ;;  %v2243_v8 = vadd.f32 %v2242_v6, %v2134_v25  ;;  %v2137_v56 = vadd.f32 %v2136_v46, %v2027_v9  ;;  %v5566_v9 = vld [vmem:[#allocation3_spill] sm:$0xff] }
 0x273   :  { %v1916_v41 = vadd.f32 %v4770_v34, %v1807_v39  ;;  %2338 = vst.msk [vmem:[%s5349_s3 + $0xd8] sm:$0xff] %vm2311_vm6, %v2243_v8  ;;  %v2141_v16 = vpop.f32.mrf.mxu2  ;;  %v5567_v8 = vld [vmem:[#allocation54_spill] sm:$0xff] }
 0x275   :  { %2337 = vst [vmem:[%s5349_s3 + $0xd0] sm:$0xff] %v1916_v41  ;;  %v2032_v27 = vpop.f32.mrf.mxu3  ;;  %v2772_v41 = vld [vmem:[%s5348_s2 + $0x1cc] sm:$0xf] }
 0x278   :  { %v1809_v7 = vpop.f32.mrf.mxu1  ;;  %v2245_v51 = vpop.f32.mrf.mxu0 }
 0x279   :  { %v1810_v17 = vadd.f32 %v1809_v7, %v4826_v12  ;;  %v2246_v0 = vadd.f32 %v2245_v51, %v2137_v56  ;;  %v2139_v12 = vadd.f32 %v2138_v21, %v2029_v22  ;;  %2076 = vmatmul.bf16.gmra.mxu3 %v4584_v23  ;;  %v2667_v22 = vld [vmem:[%s5348_s2 + $0x1d4] sm:$0xf0]  ;;  %v5568_v21 = vld [vmem:[#allocation42_spill] sm:$0xff] }
 0x27b   :  { %v1919_v34 = vadd.f32 %v4781_v15, %v1810_v17  ;;  %1848 = vmatmul.bf16.gmra.mxu1 %v2622_v52  ;;  %2340 = vst.msk [vmem:[%s5349_s3 + $0xe8] sm:$0xff] %vm2311_vm6, %v2246_v0  ;;  %2710 = vmatmul.msk.bf16.gmra.mxu0 %vm1595_vm0, %v4464_v32  ;;  %v2643_v32 = vld [vmem:[%s5348_s2 + $0x1a4] sm:$0xf0]  ;;  %v2143_v20 = vpop.f32.mrf.mxu2  ;;  %v5563_v52 = vld [vmem:[#allocation52_spill] sm:$0xff]  ;;  %v2670_v17 = vor.u32 %v2772_v41, %v2667_v22 }
 0x27c   :  { %v2646_v19 = vor.u32 %v2766_v53, %v2643_v32 }
 0x27d   :  { %2339 = vst [vmem:[%s5349_s3 + $0xe0] sm:$0xff] %v1919_v34  ;;  %v2034_v60 = vpop.f32.mrf.mxu3 }
 0x27e   :  { %2185 = vmatmul.bf16.gmra.mxu2 %v2646_v19 }
 0x280   :  { %v1811_v5 = vpop.f32.mrf.mxu1  ;;  %v2247_v43 = vpop.f32.mrf.mxu0 }
 0x281   :  { %v1812_v15 = vadd.f32 %v1811_v5, %v4837_v3  ;;  %v2248_v47 = vadd.f32 %v2247_v43, %v2139_v12  ;;  %v2142_v3 = vadd.f32 %v2141_v16, %v2032_v27  ;;  %v5569_v27 = vld [vmem:[#allocation6_spill] sm:$0xff]  ;;  %v5570_v5 = vld [vmem:[#allocation11_spill] sm:$0xff]  ;;  %v5571_v43 = vld [vmem:[#allocation45_spill] sm:$0xff] }
 0x283   :  { %v1921_v4 = vadd.f32 %v4795_v54, %v1812_v15  ;;  %2342 = vst.msk [vmem:[%s5349_s3 + $0xf8] sm:$0xff] %vm2311_vm6, %v2248_v47  ;;  %v5559_v54 = vld [vmem:[#allocation33_spill] sm:$0xff]  ;;  %v2146_v28 = vpop.f32.mrf.mxu2  ;;  %v5572_v47 = vld [vmem:[#allocation4_spill] sm:$0xff] }
 0x285   :  { %2341 = vst [vmem:[%s5349_s3 + $0xf0] sm:$0xff] %v1921_v4  ;;  %v2037_v58 = vpop.f32.mrf.mxu3 }
 0x286   :  { %v2147_v61 = vadd.f32 %v2146_v28, %v2037_v58  ;;  %v5575_v28 = vld [vmem:[#allocation12_spill] sm:$0xff] }
 0x288   :  { %v1814_v1 = vpop.f32.mrf.mxu1  ;;  %v2250_v10 = vpop.f32.mrf.mxu0 }
 0x289   :  { %v1815_v26 = vadd.f32 %v1814_v1, %v4851_v36  ;;  %v2251_v42 = vadd.f32 %v2250_v10, %v2142_v3  ;;  %v2144_v36 = vadd.f32 %v2143_v20, %v2034_v60  ;;  %2081 = vmatmul.bf16.gmra.mxu3 %v5564_v11  ;;  %v5573_v3 = vld [vmem:[#allocation9_spill] sm:$0xff] }
 0x28a   :  { %v5574_v10 = vld [vmem:[#allocation49_spill] sm:$0xff] }
 0x28b   :  { %v1924_v48 = vadd.f32 %v5559_v54, %v1815_v26  ;;  %1853 = vmatmul.bf16.gmra.mxu1 %v2634_v49  ;;  %2344 = vst.msk [vmem:[%s5349_s3 + $0x108] sm:$0xff] %vm2311_vm6, %v2251_v42  ;;  %2711 = vmatmul.msk.bf16.gmra.mxu0 %vm1595_vm0, %v5560_v2  ;;  %v2148_v45 = vpop.f32.mrf.mxu2 }
 0x28d   :  { %2343 = vst [vmem:[%s5349_s3 + $0x100] sm:$0xff] %v1924_v48  ;;  %v2039_v13 = vpop.f32.mrf.mxu3 }
 0x28e   :  { %2190 = vmatmul.bf16.gmra.mxu2 %v2658_v57  ;;  %v2149_v63 = vadd.f32 %v2148_v45, %v2039_v13  ;;  %v5578_v13 = vld [vmem:[#allocation14_spill] sm:$0xff] }
 0x290   :  { %v1816_v23 = vpop.f32.mrf.mxu1  ;;  %v2252_v30 = vpop.f32.mrf.mxu0 }
 0x291   :  { %v1817_v40 = vadd.f32 %v1816_v23, %v5561_v55  ;;  %v2253_v50 = vadd.f32 %v2252_v30, %v2144_v36  ;;  %v5576_v30 = vld [vmem:[#allocation8_spill] sm:$0xff] }
 0x293   :  { %v1926_v59 = vadd.f32 %v5562_v29, %v1817_v40  ;;  %2346 = vst.msk [vmem:[%s5349_s3 + $0x118] sm:$0xff] %vm2311_vm6, %v2253_v50  ;;  %v2151_v25 = vpop.f32.mrf.mxu2  ;;  %v5577_v40 = vld [vmem:[#allocation5_spill] sm:$0xff] }
 0x295   :  { %2345 = vst [vmem:[%s5349_s3 + $0x110] sm:$0xff] %v1926_v59  ;;  %v2042_v46 = vpop.f32.mrf.mxu3 }
 0x296   :  { %v2152_v51 = vadd.f32 %v2151_v25, %v2042_v46  ;;  %v5581_v46 = vld [vmem:[#allocation13_spill] sm:$0xff] }
 0x298   :  { %v1819_v38 = vpop.f32.mrf.mxu1  ;;  %v2255_v35 = vpop.f32.mrf.mxu0 }
 0x299   :  { %v1820_v62 = vadd.f32 %v1819_v38, %v5563_v52  ;;  %v2256_v14 = vadd.f32 %v2255_v35, %v2147_v61  ;;  %2086 = vmatmul.bf16.gmra.mxu3 %v5570_v5 }
 0x29b   :  { %v1929_v18 = vadd.f32 %v5565_v24, %v1820_v62  ;;  %1858 = vmatmul.bf16.gmra.mxu1 %v2646_v19  ;;  %2348 = vst.msk [vmem:[%s5349_s3 + $0x128] sm:$0xff] %vm2311_vm6, %v2256_v14  ;;  %2712 = vmatmul.msk.bf16.gmra.mxu0 %vm1595_vm0, %v5566_v9  ;;  %v2153_v7 = vpop.f32.mrf.mxu2  ;;  %v5580_v24 = vld [vmem:[#allocation16_spill] sm:$0xff] }
 0x29d   :  { %2347 = vst [vmem:[%s5349_s3 + $0x120] sm:$0xff] %v1929_v18  ;;  %v2044_v49 = vpop.f32.mrf.mxu3 }
 0x29e   :  { %2195 = vmatmul.bf16.gmra.mxu2 %v2670_v17  ;;  %v2154_v4 = vadd.f32 %v2153_v7, %v2044_v49 }
 0x2a0   :  { %v1821_v6 = vpop.f32.mrf.mxu1  ;;  %v2257_v39 = vpop.f32.mrf.mxu0 }
 0x2a1   :  { %v1822_v37 = vadd.f32 %v1821_v6, %v5567_v8  ;;  %v2258_v31 = vadd.f32 %v2257_v39, %v2149_v63 }
 0x2a3   :  { %v1931_v56 = vadd.f32 %v5568_v21, %v1822_v37  ;;  %2350 = vst.msk [vmem:[%s5349_s3 + $0x138] sm:$0xff] %vm2311_vm6, %v2258_v31  ;;  %v2156_v32 = vpop.f32.mrf.mxu2  ;;  %v5582_v31 = vld [vmem:[#allocation18_spill] sm:$0xff]  ;;  %v5583_v21 = vld [vmem:[#allocation15_spill] sm:$0xff] }
 0x2a5   :  { %2349 = vst [vmem:[%s5349_s3 + $0x130] sm:$0xff] %v1931_v56  ;;  %v2047_v53 = vpop.f32.mrf.mxu3 }
 0x2a6   :  { %v2157_v48 = vadd.f32 %v2156_v32, %v2047_v53 }
 0x2a8   :  { %v1824_v0 = vpop.f32.mrf.mxu1  ;;  %v2260_v34 = vpop.f32.mrf.mxu0 }
 0x2a9   :  { %v1825_v16 = vadd.f32 %v1824_v0, %v5569_v27  ;;  %v2261_v12 = vadd.f32 %v2260_v34, %v2152_v51  ;;  %v5584_v34 = vld [vmem:[#allocation20_spill] sm:$0xff] }
 0x2ab   :  { %v1934_v15 = vadd.f32 %v5571_v43, %v1825_v16  ;;  %1863 = vmatmul.bf16.gmra.mxu1 %v2658_v57  ;;  %2352 = vst.msk [vmem:[%s5349_s3 + $0x148] sm:$0xff] %vm2311_vm6, %v2261_v12  ;;  %2713 = vmatmul.msk.bf16.gmra.mxu0 %vm1595_vm0, %v5572_v47  ;;  %v2158_v54 = vpop.f32.mrf.mxu2  ;;  %v5579_v57 = vld [vmem:[#allocation10_spill] sm:$0xff]  ;;  %v5585_v12 = vld [vmem:[#allocation17_spill] sm:$0xff] }
 0x2ad   :  { %2351 = vst [vmem:[%s5349_s3 + $0x140] sm:$0xff] %v1934_v15  ;;  %v2049_v42 = vpop.f32.mrf.mxu3 }
 0x2ae   :  { %v2159_v33 = vadd.f32 %v2158_v54, %v2049_v42 }
 0x2b0   :  { %v1826_v60 = vpop.f32.mrf.mxu1  ;;  %v2262_v20 = vpop.f32.mrf.mxu0 }
 0x2b1   :  { %v1827_v19 = vadd.f32 %v1826_v60, %v5573_v3  ;;  %v2263_v1 = vadd.f32 %v2262_v20, %v2154_v4  ;;  %v5586_v4 = vld [vmem:[#allocation22_spill] sm:$0xff]  ;;  %v5587_v3 = vld [vmem:[#allocation19_spill] sm:$0xff] }
 0x2b3   :  { %v1936_v26 = vadd.f32 %v5574_v10, %v1827_v19  ;;  %2354 = vst.msk [vmem:[%s5349_s3 + $0x158] sm:$0xff] %vm2311_vm6, %v2263_v1  ;;  %v2161_v44 = vpop.f32.mrf.mxu2 }
 0x2b5   :  { %2353 = vst [vmem:[%s5349_s3 + $0x150] sm:$0xff] %v1936_v26  ;;  %v2052_v50 = vpop.f32.mrf.mxu3 }
 0x2b6   :  { %v2162_v62 = vadd.f32 %v2161_v44, %v2052_v50  ;;  %v5590_v44 = vld [vmem:[#allocation26_spill] sm:$0xff] }
 0x2b8   :  { %v1829_v2 = vpop.f32.mrf.mxu1  ;;  %v2265_v58 = vpop.f32.mrf.mxu0 }
 0x2b9   :  { %v1830_v36 = vadd.f32 %v1829_v2, %v5575_v28  ;;  %v2266_v23 = vadd.f32 %v2265_v58, %v2157_v48  ;;  %v5588_v48 = vld [vmem:[#allocation24_spill] sm:$0xff]  ;;  %v5589_v28 = vld [vmem:[#allocation21_spill] sm:$0xff] }
 0x2bb   :  { %v1939_v55 = vadd.f32 %v5576_v30, %v1830_v36  ;;  %1868 = vmatmul.bf16.gmra.mxu1 %v2670_v17  ;;  %2356 = vst.msk [vmem:[%s5349_s3 + $0x168] sm:$0xff] %vm2311_vm6, %v2266_v23  ;;  %2714 = vmatmul.msk.bf16.gmra.mxu0 %vm1595_vm0, %v5577_v40  ;;  %v2163_v52 = vpop.f32.mrf.mxu2 }
 0x2bd   :  { %2355 = vst [vmem:[%s5349_s3 + $0x160] sm:$0xff] %v1939_v55  ;;  %v2054_v35 = vpop.f32.mrf.mxu3 }
 0x2be   :  { %v2164_v39 = vadd.f32 %v2163_v52, %v2054_v35  ;;  %v5592_v52 = vld [vmem:[#allocation28_spill] sm:$0xff] }
 0x2c0   :  { %v1831_v29 = vpop.f32.mrf.mxu1  ;;  %v2267_v59 = vpop.f32.mrf.mxu0 }
 0x2c1   :  { %v1832_v45 = vadd.f32 %v1831_v29, %v5578_v13  ;;  %v2268_v61 = vadd.f32 %v2267_v59, %v2159_v33  ;;  %v5591_v59 = vld [vmem:[#allocation23_spill] sm:$0xff] }
 0x2c3   :  { %v1941_v38 = vadd.f32 %v5579_v57, %v1832_v45  ;;  %2358 = vst.msk [vmem:[%s5349_s3 + $0x178] sm:$0xff] %vm2311_vm6, %v2268_v61  ;;  %v2166_v6 = vpop.f32.mrf.mxu2 }
 0x2c5   :  { %2357 = vst [vmem:[%s5349_s3 + $0x170] sm:$0xff] %v1941_v38  ;;  %v2057_v63 = vpop.f32.mrf.mxu3 }
 0x2c6   :  { %v2167_v51 = vadd.f32 %v2166_v6, %v2057_v63  ;;  %v5594_v6 = vld [vmem:[#allocation30_spill] sm:$0xff] }
 0x2c8   :  { %v1834_v14 = vpop.f32.mrf.mxu1  ;;  %v2270_v11 = vpop.f32.mrf.mxu0 }
 0x2c9   :  { %v1835_v18 = vadd.f32 %v1834_v14, %v5580_v24  ;;  %v2271_v9 = vadd.f32 %v2270_v11, %v2162_v62  ;;  %v5593_v11 = vld [vmem:[#allocation25_spill] sm:$0xff] }
 0x2cb   :  { %v1944_v25 = vadd.f32 %v5581_v46, %v1835_v18  ;;  %2360 = vst.msk [vmem:[%s5349_s3 + $0x188] sm:$0xff] %vm2311_vm6, %v2271_v9  ;;  %v2168_v7 = vpop.f32.mrf.mxu2 }
 0x2cd   :  { %2359 = vst [vmem:[%s5349_s3 + $0x180] sm:$0xff] %v1944_v25  ;;  %v2059_v49 = vpop.f32.mrf.mxu3 }
 0x2ce   :  { %v2169_v47 = vadd.f32 %v2168_v7, %v2059_v49  ;;  %v5596_v7 = vld [vmem:[#allocation32_spill] sm:$0xff] }
 0x2d0   :  { %v1836_v8 = vpop.f32.mrf.mxu1  ;;  %v2272_v37 = vpop.f32.mrf.mxu0 }
 0x2d1   :  { %v1837_v41 = vadd.f32 %v1836_v8, %v5582_v31  ;;  %v2273_v22 = vadd.f32 %v2272_v37, %v2164_v39  ;;  %v5595_v37 = vld [vmem:[#allocation27_spill] sm:$0xff] }
 0x2d3   :  { %v1946_v56 = vadd.f32 %v5583_v21, %v1837_v41  ;;  %2362 = vst.msk [vmem:[%s5349_s3 + $0x198] sm:$0xff] %vm2311_vm6, %v2273_v22  ;;  %v2171_v15 = vpop.f32.mrf.mxu2 }
 0x2d5   :  { %2361 = vst [vmem:[%s5349_s3 + $0x190] sm:$0xff] %v1946_v56  ;;  %v2062_v43 = vpop.f32.mrf.mxu3 }
 0x2d6   :  { %v2172_v26 = vadd.f32 %v2171_v15, %v2062_v43  ;;  %v5598_v15 = vld [vmem:[#allocation35_spill] sm:$0xff] }
 0x2d8   :  { %v1839_v17 = vpop.f32.mrf.mxu1  ;;  %v2275_v0 = vpop.f32.mrf.mxu0 }
 0x2d9   :  { %v1840_v27 = vadd.f32 %v1839_v17, %v5584_v34  ;;  %v2276_v16 = vadd.f32 %v2275_v0, %v2167_v51  ;;  %v5597_v0 = vld [vmem:[#allocation29_spill] sm:$0xff] }
 0x2db   :  { %v1949_v5 = vadd.f32 %v5585_v12, %v1840_v27  ;;  %2364 = vst.msk [vmem:[%s5349_s3 + $0x1a8] sm:$0xff] %vm2311_vm6, %v2276_v16  ;;  %v2173_v10 = vpop.f32.mrf.mxu2 }
 0x2dd   :  { %2363 = vst [vmem:[%s5349_s3 + $0x1a0] sm:$0xff] %v1949_v5  ;;  %v2064_v1 = vpop.f32.mrf.mxu3 }
 0x2de   :  { %v2174_v55 = vadd.f32 %v2173_v10, %v2064_v1  ;;  %v5600_v10 = vld [vmem:[#allocation38_spill] sm:$0xff] }
 0x2e0   :  { %v1841_v53 = vpop.f32.mrf.mxu1  ;;  %v2277_v32 = vpop.f32.mrf.mxu0 }
 0x2e1   :  { %v1842_v60 = vadd.f32 %v1841_v53, %v5586_v4  ;;  %v2278_v20 = vadd.f32 %v2277_v32, %v2169_v47  ;;  %v5599_v32 = vld [vmem:[#allocation31_spill] sm:$0xff] }
 0x2e3   :  { %v1951_v19 = vadd.f32 %v5587_v3, %v1842_v60  ;;  %2366 = vst.msk [vmem:[%s5349_s3 + $0x1b8] sm:$0xff] %vm2311_vm6, %v2278_v20  ;;  %v2176_v30 = vpop.f32.mrf.mxu2 }
 0x2e5   :  { %2365 = vst [vmem:[%s5349_s3 + $0x1b0] sm:$0xff] %v1951_v19  ;;  %v2067_v23 = vpop.f32.mrf.mxu3 }
 0x2e6   :  { %v2177_v57 = vadd.f32 %v2176_v30, %v2067_v23  ;;  %v5602_v30 = vld [vmem:[#allocation41_spill] sm:$0xff] }
 0x2e8   :  { %v1844_v42 = vpop.f32.mrf.mxu1  ;;  %v2280_v54 = vpop.f32.mrf.mxu0 }
 0x2e9   :  { %v1845_v2 = vadd.f32 %v1844_v42, %v5588_v48  ;;  %v2281_v58 = vadd.f32 %v2280_v54, %v2172_v26  ;;  %v5601_v54 = vld [vmem:[#allocation34_spill] sm:$0xff] }
 0x2eb   :  { %v1954_v36 = vadd.f32 %v5589_v28, %v1845_v2  ;;  %2368 = vst.msk [vmem:[%s5349_s3 + $0x1c8] sm:$0xff] %vm2311_vm6, %v2281_v58  ;;  %v2178_v61 = vpop.f32.mrf.mxu2 }
 0x2ed   :  { %2367 = vst [vmem:[%s5349_s3 + $0x1c0] sm:$0xff] %v1954_v36  ;;  %v2069_v45 = vpop.f32.mrf.mxu3 }
 0x2ee   :  { %v2179_v46 = vadd.f32 %v2178_v61, %v2069_v45  ;;  %v5604_v61 = vld [vmem:[#allocation44_spill] sm:$0xff] }
 0x2f0   :  { %v1846_v40 = vpop.f32.mrf.mxu1  ;;  %v2282_v50 = vpop.f32.mrf.mxu0 }
 0x2f1   :  { %v1847_v33 = vadd.f32 %v1846_v40, %v5590_v44  ;;  %v2283_v29 = vadd.f32 %v2282_v50, %v2174_v55  ;;  %v5603_v50 = vld [vmem:[#allocation37_spill] sm:$0xff] }
 0x2f3   :  { %v1956_v13 = vadd.f32 %v5591_v59, %v1847_v33  ;;  %2370 = vst.msk [vmem:[%s5349_s3 + $0x1d8] sm:$0xff] %vm2311_vm6, %v2283_v29  ;;  %v2181_v9 = vpop.f32.mrf.mxu2 }
 0x2f5   :  { %2369 = vst [vmem:[%s5349_s3 + $0x1d0] sm:$0xff] %v1956_v13  ;;  %v2072_v18 = vpop.f32.mrf.mxu3 }
 0x2f6   :  { %v2182_v21 = vadd.f32 %v2181_v9, %v2072_v18 }
 0x2f8   :  { %v1849_v38 = vpop.f32.mrf.mxu1  ;;  %v2285_v35 = vpop.f32.mrf.mxu0 }
 0x2f9   :  { %v1850_v62 = vadd.f32 %v1849_v38, %v5592_v52  ;;  %v2286_v14 = vadd.f32 %v2285_v35, %v2177_v57  ;;  %v5605_v35 = vld [vmem:[#allocation40_spill] sm:$0xff] }
 0x2fb   :  { %v1959_v24 = vadd.f32 %v5593_v11, %v1850_v62  ;;  %2372 = vst.msk [vmem:[%s5349_s3 + $0x1e8] sm:$0xff] %vm2311_vm6, %v2286_v14  ;;  %v2183_v22 = vpop.f32.mrf.mxu2 }
 0x2fd   :  { %2371 = vst [vmem:[%s5349_s3 + $0x1e0] sm:$0xff] %v1959_v24  ;;  %v2074_v41 = vpop.f32.mrf.mxu3  ;;  %v5606_v24 = vld [vmem:[#allocation47_spill] sm:$0xff] }
 0x2fe   :  { %v2184_v12 = vadd.f32 %v2183_v22, %v2074_v41 }
 0x300   :  { %v1851_v25 = vpop.f32.mrf.mxu1  ;;  %v2287_v63 = vpop.f32.mrf.mxu0 }
 0x301   :  { %v1852_v39 = vadd.f32 %v1851_v25, %v5594_v6  ;;  %v2288_v8 = vadd.f32 %v2287_v63, %v2179_v46  ;;  %v5607_v63 = vld [vmem:[#allocation43_spill] sm:$0xff] }
 0x303   :  { %v1961_v31 = vadd.f32 %v5595_v37, %v1852_v39  ;;  %2374 = vst.msk [vmem:[%s5349_s3 + $0x1f8] sm:$0xff] %vm2311_vm6, %v2288_v8  ;;  %v2186_v16 = vpop.f32.mrf.mxu2 }
 0x305   :  { %2373 = vst [vmem:[%s5349_s3 + $0x1f0] sm:$0xff] %v1961_v31  ;;  %v2077_v27 = vpop.f32.mrf.mxu3  ;;  %v5608_v31 = vld [vmem:[#allocation51_spill] sm:$0xff] }
 0x306   :  { %v2187_v3 = vadd.f32 %v2186_v16, %v2077_v27 }
 0x308   :  { %v1854_v56 = vpop.f32.mrf.mxu1  ;;  %v2290_v49 = vpop.f32.mrf.mxu0 }
 0x309   :  { %v1855_v51 = vadd.f32 %v1854_v56, %v5596_v7  ;;  %v2291_v17 = vadd.f32 %v2290_v49, %v2182_v21  ;;  %v5609_v21 = vld [vmem:[#allocation46_spill] sm:$0xff] }
 0x30b   :  { %v1964_v34 = vadd.f32 %v5597_v0, %v1855_v51  ;;  %2376 = vst.msk [vmem:[%s5349_s3 + $0x208] sm:$0xff] %vm2311_vm6, %v2291_v17  ;;  %v2188_v20 = vpop.f32.mrf.mxu2 }
 0x30d   :  { %2375 = vst [vmem:[%s5349_s3 + $0x200] sm:$0xff] %v1964_v34  ;;  %v2079_v60 = vpop.f32.mrf.mxu3  ;;  %v5610_v34 = vld [vmem:[#allocation53_spill] sm:$0xff] }
 0x30e   :  { %v2189_v28 = vadd.f32 %v2188_v20, %v2079_v60 }
 0x310   :  { %v1856_v5 = vpop.f32.mrf.mxu1  ;;  %v2292_v43 = vpop.f32.mrf.mxu0 }
 0x311   :  { %v1857_v47 = vadd.f32 %v1856_v5, %v5598_v15  ;;  %v2293_v53 = vadd.f32 %v2292_v43, %v2184_v12  ;;  %v5611_v12 = vld [vmem:[#allocation50_spill] sm:$0xff] }
 0x313   :  { %v1966_v4 = vadd.f32 %v5599_v32, %v1857_v47  ;;  %2378 = vst.msk [vmem:[%s5349_s3 + $0x218] sm:$0xff] %vm2311_vm6, %v2293_v53  ;;  %v2191_v58 = vpop.f32.mrf.mxu2 }
 0x315   :  { %2377 = vst [vmem:[%s5349_s3 + $0x210] sm:$0xff] %v1966_v4  ;;  %v2082_v2 = vpop.f32.mrf.mxu3 }
 0x316   :  { %v2192_v33 = vadd.f32 %v2191_v58, %v2082_v2 }
 0x318   :  { %v1859_v19 = vpop.f32.mrf.mxu1  ;;  %v2295_v1 = vpop.f32.mrf.mxu0 }
 0x319   :  { %v1860_v26 = vadd.f32 %v1859_v19, %v5600_v10  ;;  %v2296_v42 = vadd.f32 %v2295_v1, %v2187_v3 }
 0x31b   :  { %v1969_v48 = vadd.f32 %v5601_v54, %v1860_v26  ;;  %2380 = vst.msk [vmem:[%s5349_s3 + $0x228] sm:$0xff] %vm2311_vm6, %v2296_v42  ;;  %v2193_v59 = vpop.f32.mrf.mxu2 }
 0x31d   :  { %2379 = vst [vmem:[%s5349_s3 + $0x220] sm:$0xff] %v1969_v48  ;;  %v2084_v29 = vpop.f32.mrf.mxu3 }
 0x31e   :  { %v2194_v62 = vadd.f32 %v2193_v59, %v2084_v29 }
 0x320   :  { %v1861_v36 = vpop.f32.mrf.mxu1  ;;  %v2297_v23 = vpop.f32.mrf.mxu0 }
 0x321   :  { %v1862_v55 = vadd.f32 %v1861_v36, %v5602_v30  ;;  %v2298_v40 = vadd.f32 %v2297_v23, %v2189_v28 }
 0x323   :  { %v1971_v44 = vadd.f32 %v5603_v50, %v1862_v55  ;;  %2382 = vst.msk [vmem:[%s5349_s3 + $0x238] sm:$0xff] %vm2311_vm6, %v2298_v40  ;;  %v2196_v25 = vpop.f32.mrf.mxu2 }
 0x325   :  { %2381 = vst [vmem:[%s5349_s3 + $0x230] sm:$0xff] %v1971_v44  ;;  %v2087_v46 = vpop.f32.mrf.mxu3 }
 0x326   :  { %v2197_v39 = vadd.f32 %v2196_v25, %v2087_v46 }
 0x328   :  { %v1864_v13 = vpop.f32.mrf.mxu1  ;;  %v2300_v45 = vpop.f32.mrf.mxu0 }
 0x329   :  { %v1865_v57 = vadd.f32 %v1864_v13, %v5604_v61  ;;  %v2301_v38 = vadd.f32 %v2300_v45, %v2192_v33 }
 0x32b   :  { %v1974_v52 = vadd.f32 %v5605_v35, %v1865_v57  ;;  %2384 = vst.msk [vmem:[%s5349_s3 + $0x248] sm:$0xff] %vm2311_vm6, %v2301_v38  ;;  %v2198_v7 = vpop.f32.mrf.mxu2 }
 0x32d   :  { %2383 = vst [vmem:[%s5349_s3 + $0x240] sm:$0xff] %v1974_v52  ;;  %v2089_v49 = vpop.f32.mrf.mxu3 }
 0x32e   :  { %v2199_v51 = vadd.f32 %v2198_v7, %v2089_v49 }
 0x330   :  { %v1866_v14 = vpop.f32.mrf.mxu1  ;;  %v2302_v11 = vpop.f32.mrf.mxu0 }
 0x331   :  { %v1867_v18 = vadd.f32 %v1866_v14, %v5606_v24  ;;  %v2303_v9 = vadd.f32 %v2302_v11, %v2194_v62 }
 0x333   :  { %v1976_v6 = vadd.f32 %v5607_v63, %v1867_v18  ;;  %2386 = vst.msk [vmem:[%s5349_s3 + $0x258] sm:$0xff] %vm2311_vm6, %v2303_v9 }
 0x335   :  { %2385 = vst [vmem:[%s5349_s3 + $0x250] sm:$0xff] %v1976_v6 }
 0x338   :  { %v1869_v8 = vpop.f32.mrf.mxu1  ;;  %v2305_v37 = vpop.f32.mrf.mxu0 }
 0x339   :  { %v1870_v41 = vadd.f32 %v1869_v8, %v5608_v31  ;;  %v2306_v22 = vadd.f32 %v2305_v37, %v2197_v39 }
 0x33b   :  { %v1979_v56 = vadd.f32 %v5609_v21, %v1870_v41  ;;  %2388 = vst.msk [vmem:[%s5349_s3 + $0x268] sm:$0xff] %vm2311_vm6, %v2306_v22 }
 0x33d   :  { %2387 = vst [vmem:[%s5349_s3 + $0x260] sm:$0xff] %v1979_v56 }
 0x340   :  { %v1871_v17 = vpop.f32.mrf.mxu1  ;;  %v2307_v0 = vpop.f32.mrf.mxu0 }
 0x341   :  { %v1872_v27 = vadd.f32 %v1871_v17, %v5610_v34  ;;  %v2308_v16 = vadd.f32 %v2307_v0, %v2199_v51 }
 0x343   :  { %v1981_v5 = vadd.f32 %v5611_v12, %v1872_v27  ;;  %2390 = vst.msk [vmem:[%s5349_s3 + $0x278] sm:$0xff] %vm2311_vm6, %v2308_v16 }
 0x345   :  { %2389 = vst [vmem:[%s5349_s3 + $0x270] sm:$0xff] %v1981_v5 }

</bundles_post_ra>
